<compile_context>
chip_gen: v7x
topology: tpu7x:2x2x1
jax: 0.10.0
libtpu: 0.0.40
codegen_flags: <defaults>
</compile_context>

<pallas_src>
import numpy as np
import jax
import jax.numpy as jnp
from jax import lax
from jax.experimental import pallas as pl
from jax.experimental.pallas import tpu as pltpu

BN_EPS = 1e-5        # nn.BatchNorm2d default eps
FUSION_EPS = 1e-4    # BiFPNModule eps


# --------------------------------------------------------------------------
# small helpers (wrapper side)
# --------------------------------------------------------------------------

def _fast_attention_weights(w):     # relu -> normalize over dim 0 (+ eps)
    w = jax.nn.relu(w)
    return w / (jnp.sum(w, axis=0, keepdims=True) + FUSION_EPS)


def _round_up(x, m):
    return (x + m - 1) // m * m


def _make_pool_select(H, W, B):
    """Block-diagonal (B*H*W, B*(H/2)*(W/2)) 0/1 matrix compacting the top-left
    anchored 2x2-max values of every batch plane in the lane-folded layout."""
    h, w = H // 2, W // 2
    S = np.zeros((B * H * W, B * h * w), np.float32)
    for b in range(B):
        for y in range(h):
            for x in range(w):
                S[b * H * W + (2 * y) * W + 2 * x, b * h * w + y * w + x] = 1.0
    return jnp.asarray(S, jnp.bfloat16)


# --------------------------------------------------------------------------
# fused Pallas kernel (laterals + all stacked BiFPN modules, per batch block)
# --------------------------------------------------------------------------

def _make_bifpn_kernel(levels, stack, c_out, spatial, b_tile, margin, out_offs):
    Hs = [h for h, _ in spatial]
    Ws = [w for _, w in spatial]
    Ls = [b_tile * h * w for h, w in spatial]
    L_max = max(Ls)
    n_bu = levels - 1              # bottom-up convs per module
    nf1 = 2 * levels               # flattened w1 length per module
    nf2 = 3 * (levels - 2)         # flattened w2 length per module

    def kernel(*refs):
        k = 0
        fw_ref = refs[k]; k += 1                       # SMEM fusion weights (flat)
        x_refs = refs[k:k + levels]; k += levels       # (1, Cin_i, L_i) f32
        wl_refs = refs[k:k + levels]; k += levels      # (C, Cin_i) bf16
        bias_ref = refs[k]; k += 1                     # (levels+stack*n_bu, C, 1) f32
        wc_ref = refs[k]; k += 1                       # (stack*n_bu, C, 9C) bf16
        sp_refs = refs[k:k + levels - 1]; k += levels - 1   # (L_i, L_i/4) bf16
        out_ref = refs[k]; k += 1                      # (1, C, TOT) f32
        pbuf = refs[k]; k += 1                         # (C, 2*margin+L_max) bf16
        patch = refs[k]                                # (9C, L_max) bf16 im2col

        # Only the right fringe needs to be finite (NaN * 0 would poison the pool
        # selection matmul); everything else is overwritten or masked before use.
        pbuf[:, margin + L_max:] = jnp.zeros((c_out, margin), jnp.bfloat16)

        def swish(y):
            return y * jax.nn.sigmoid(y)

        # ---- boundary masks (True where a shifted read leaves its own plane) ----
        mask_cache = {}

        def base_masks(lvl):
            if lvl not in mask_cache:
                H, W, L = Hs[lvl], Ws[lvl], Ls[lvl]
                lane = lax.broadcasted_iota(jnp.int32, (c_out, L), 1)
                if (W & (W - 1)) == 0:
                    x = lane & (W - 1)
                else:
                    x = lane % W
                if (W & (W - 1)) == 0 and (H & (H - 1)) == 0:
                    y = (lane >> int(round(np.log2(W)))) & (H - 1)
                else:
                    y = (lane // W) % H
                mask_cache[lvl] = {(-1, 'x'): x == 0, (1, 'x'): x == W - 1,
                                   (-1, 'y'): y == 0, (1, 'y'): y == H - 1}
            return mask_cache[lvl]

        def shift_mask(lvl, dy, dx):
            masks = base_masks(lvl)
            m = None
            if dy != 0:
                m = masks[(dy, 'y')]
            if dx != 0:
                mx = masks[(dx, 'x')]
                m = mx if m is None else (m | mx)
            return m

        def conv3x3(fused_f32, conv_idx, lvl):
            """3x3 conv + folded-BN bias + Swish as ONE im2col MXU matmul (K=9C)."""
            W, L = Ws[lvl], Ls[lvl]
            pbuf[:, margin:margin + L] = fused_f32.astype(jnp.bfloat16)
            j = 0
            for dy in (-1, 0, 1):
                for dx in (-1, 0, 1):
                    s = dy * W + dx
                    sh = pbuf[:, margin + s:margin + s + L]
                    m = shift_mask(lvl, dy, dx)
                    if m is not None:
                        sh = jnp.where(m, jnp.zeros_like(sh), sh)
                    patch[j * c_out:(j + 1) * c_out, :L] = sh
                    j += 1
            y = jnp.dot(wc_ref[conv_idx], patch[:, :L],
                        preferred_element_type=jnp.float32)
            return swish(y + bias_ref[levels + conv_idx])       # (C, L) f32

        def maxpool2x2(f_f32, lvl):
            """2x2/stride-2 max pool: 3 shifted reads + max + 0/1 selection matmul.
            No zero-fill needed: wrapped / stale reads only reach positions the
            selection matrix multiplies by zero (stale values are always finite)."""
            W, L = Ws[lvl], Ls[lvl]
            v = f_f32.astype(jnp.bfloat16)
            pbuf[:, margin:margin + L] = v
            m = jnp.maximum(
                jnp.maximum(v, pbuf[:, margin + 1:margin + 1 + L]),
                jnp.maximum(pbuf[:, margin + W:margin + W + L],
                            pbuf[:, margin + W + 1:margin + W + 1 + L]))
            return jnp.dot(m, sp_refs[lvl][...], preferred_element_type=jnp.float32)

        # ---- lateral 1x1 convs (weights-stationary, batch folded onto lanes) ----
        feats = []
        for i in range(levels):
            x = x_refs[i][0].astype(jnp.bfloat16)               # (Cin_i, L_i)
            y = jnp.dot(wl_refs[i][...], x, preferred_element_type=jnp.float32)
            feats.append(swish(y + bias_ref[i]))                # (C, L_i) f32

        # ---- stacked BiFPN modules (faithful to the reference's list aliasing) ----
        for mod in range(stack):
            base = mod * (nf1 + nf2)

            def w1(r, c, base=base):
                return fw_ref[base + r * levels + c]

            def w2(r, c, base=base):
                return fw_ref[base + nf1 + r * (levels - 2) + c]

            module_in = list(feats)
            bu = list(feats)
            # NOTE: the reference top-down pathway writes td_features only; the
            # bottom-up pathway reads bu_features / inputs which still alias the
            # original module inputs, so top-down results never reach the returned
            # features.  It is skipped here (outputs are unchanged).
            for t in range(levels - 2):
                pooled = maxpool2x2(bu[t], t)
                fused = (w2(0, t) * bu[t + 1] + w2(1, t) * pooled
                         + w2(2, t) * module_in[t + 1])
                bu[t + 1] = conv3x3(fused, mod * n_bu + t, t + 1)
            pooled = maxpool2x2(bu[levels - 2], levels - 2)
            fused = (w1(0, levels - 1) * bu[levels - 1]
                     + w1(1, levels - 1) * pooled)
            bu[levels - 1] = conv3x3(fused, mod * n_bu + n_bu - 1, levels - 1)
            feats = bu

        # ---- lane-packed output slab (each level at a 128-aligned offset) ----
        for i in range(levels):
            out_ref[0, :, out_offs[i]:out_offs[i] + Ls[i]] = (
                feats[i].astype(out_ref.dtype))

    return kernel


# --------------------------------------------------------------------------
# public forward (PyTorch-convention NCHW in / NCHW out)
# --------------------------------------------------------------------------

def bifpn_forward(inputs_nchw, params, num_outs, batch_blocks=None):
    levels = len(inputs_nchw)
    N = inputs_nchw[0].shape[0]
    c_out = params['lateral'][0]['w'].shape[1]
    spatial = [(int(x.shape[2]), int(x.shape[3])) for x in inputs_nchw]
    stack = len(params['bifpn'])
    n_bu = levels - 1

    for i in range(levels - 1):                 # pyramid must halve per level
        assert spatial[i][0] == 2 * spatial[i + 1][0]
        assert spatial[i][1] == 2 * spatial[i + 1][1]

    # Batch folding: keep 2 grid blocks when possible (v7x: one per TensorCore);
    # remaining batch is folded onto the lane axis for fatter, lane-denser steps.
    if batch_blocks is None:
        batch_blocks = 2 if (N % 2 == 0 and N >= 2) else 1
    assert N % batch_blocks == 0
    b_tile = N // batch_blocks

    Ls = [b_tile * h * w for h, w in spatial]
    L_max = max(Ls)
    max_W = max(w for _, w in spatial)
    margin = _round_up(max_W + 1, 128)
    assert margin > max_W

    out_offs, tot = [], 0
    for L in Ls:
        out_offs.append(tot)
        tot += _round_up(L, 128)

    # activations: fold batch onto the lane axis -> (blocks, Cin, b_tile*H*W)
    xs = []
    for x, (h, w) in zip(inputs_nchw, spatial):
        cin = x.shape[1]
        xf = x.reshape(batch_blocks, b_tile, cin, h * w)
        xf = jnp.transpose(xf, (0, 2, 1, 3)).reshape(batch_blocks, cin,
                                                     b_tile * h * w)
        xs.append(xf)

    # weights in kernel layout: bf16 MXU operands, f32 biases (stacked)
    wl = [jnp.asarray(p['w']).T.astype(jnp.bfloat16) for p in params['lateral']]
    bias_parts = [jnp.asarray(p['b']).reshape(c_out, 1) for p in params['lateral']]
    fw_parts, wc_parts = [], []
    for bp in params['bifpn']:
        fw_parts.append(_fast_attention_weights(bp['w1']).reshape(-1))
        fw_parts.append(_fast_attention_weights(bp['w2']).reshape(-1))
        # only the bottom-up convs (original indices levels-1 .. 2*levels-3) feed
        # the returned features (see NOTE in the kernel)
        for conv in bp['convs'][levels - 1:2 * (levels - 1)]:
            wc_parts.append(jnp.transpose(conv['w'], (3, 0, 1, 2))
                            .reshape(c_out, 9 * c_out))
            bias_parts.append(jnp.asarray(conv['b']).reshape(c_out, 1))
    fw = jnp.concatenate(fw_parts).astype(jnp.float32)
    wc = jnp.stack(wc_parts).astype(jnp.bfloat16)            # (stack*n_bu, C, 9C)
    bias_all = jnp.stack(bias_parts).astype(jnp.float32)     # (levels+stack*n_bu, C, 1)

    spool = [_make_pool_select(h, w, b_tile) for h, w in spatial[:-1]]

    kernel = _make_bifpn_kernel(levels, stack, c_out, spatial, b_tile, margin,
                                out_offs)

    in_specs = [pl.BlockSpec(memory_space=pltpu.MemorySpace.SMEM)]
    in_specs += [pl.BlockSpec((1, xs[i].shape[1], Ls[i]), lambda n: (n, 0, 0))
                 for i in range(levels)]
    in_specs += [pl.BlockSpec(wl[i].shape, lambda n: (0, 0)) for i in range(levels)]
    in_specs += [pl.BlockSpec(bias_all.shape, lambda n: (0, 0, 0))]
    in_specs += [pl.BlockSpec(wc.shape, lambda n: (0, 0, 0))]
    in_specs += [pl.BlockSpec(spool[i].shape, lambda n: (0, 0))
                 for i in range(levels - 1)]

    out_specs = pl.BlockSpec((1, c_out, tot), lambda n: (n, 0, 0))
    out_shape = jax.ShapeDtypeStruct((batch_blocks, c_out, tot), jnp.float32)

    out_slab = pl.pallas_call(
        kernel,
        out_shape=out_shape,
        grid=(batch_blocks,),
        in_specs=in_specs,
        out_specs=out_specs,
        scratch_shapes=[pltpu.VMEM((c_out, 2 * margin + L_max), jnp.bfloat16),
                        pltpu.VMEM((9 * c_out, L_max), jnp.bfloat16)],
        compiler_params=pltpu.CompilerParams(
            dimension_semantics=("parallel",),       # v7x: one block per TC
            vmem_limit_bytes=32 * 1024 * 1024),
    )(fw, *xs, *wl, bias_all, wc, *spool)

    # unpack the lane-packed slab back to NCHW (cheap XLA ops outside the kernel)
    outs = []
    for i, (h, w) in enumerate(spatial):
        seg = out_slab[:, :, out_offs[i]:out_offs[i] + Ls[i]]
        seg = seg.reshape(batch_blocks, c_out, b_tile, h, w)
        seg = jnp.transpose(seg, (0, 2, 1, 3, 4)).reshape(N, c_out, h, w)
        outs.append(seg)
    if num_outs > len(outs):
        for _ in range(num_outs - len(outs)):
            # F.max_pool2d(x, 1, stride=2) == stride-2 subsampling
            outs.append(outs[-1][:, :, ::2, ::2])
    # NOTE: the reference's trailing `bifpn_module(laterals)` result is discarded
    # and does not affect the returned outputs; it is skipped here.
    return tuple(outs)


# --------------------------------------------------------------------------
# pure-JAX f32 reference (same folded-BN params, same output semantics)
# --------------------------------------------------------------------------

def _reference_forward(inputs_nchw, params, num_outs):
    levels = len(inputs_nchw)

    def swish(x):
        return x * jax.nn.sigmoid(x)

    def lateral_ref(x, w, b):
        return swish(jnp.einsum('nchw,cd->ndhw', x, w) + b.reshape(1, -1, 1, 1))

    def conv3x3_ref(x, w, b):
        y = jax.lax.conv_general_dilated(
            x, w, window_strides=(1, 1), padding='SAME',
            dimension_numbers=('NCHW', 'HWIO', 'NCHW'))
        return swish(y + b.reshape(1, -1, 1, 1))

    def maxpool_ref(x):
        n, c, h, w = x.shape
        return jnp.max(x.reshape(n, c, h // 2, 2, w // 2, 2), axis=(3, 5))

    feats = [lateral_ref(x, p['w'], p['b'])
             for x, p in zip(inputs_nchw, params['lateral'])]
    for bp in params['bifpn']:
        w1 = _fast_attention_weights(bp['w1'])
        w2 = _fast_attention_weights(bp['w2'])
        convs = bp['convs']
        module_in = list(feats)
        bu = list(feats)
        # top-down pathway is dead w.r.t. the returned bu_features (aliasing quirk)
        for i in range(levels - 2):
            fused = (w2[0, i] * bu[i + 1] + w2[1, i] * maxpool_ref(bu[i])
                     + w2[2, i] * module_in[i + 1])
            bu[i + 1] = conv3x3_ref(fused, convs[levels - 1 + i]['w'],
                                    convs[levels - 1 + i]['b'])
        fused = (w1[0, levels - 1] * bu[levels - 1]
                 + w1[1, levels - 1] * maxpool_ref(bu[levels - 2]))
        bu[levels - 1] = conv3x3_ref(fused, convs[2 * levels - 3]['w'],
                                     convs[2 * levels - 3]['b'])
        feats = bu
    outs = list(feats)
    if num_outs > len(outs):
        for _ in range(num_outs - len(outs)):
            outs.append(outs[-1][:, :, ::2, ::2])
    return tuple(outs)


# --------------------------------------------------------------------------
# deterministic parameter init (mirrors BiFPN.init_weights, BN folded)
# --------------------------------------------------------------------------

def _init_conv_bn(key, cin, cout, k):
    """Kaiming-normal (fan_out, relu) conv weight with identity BN folded in."""
    std = np.sqrt(2.0 / (k * k * cout))
    w = jax.random.normal(key, (k, k, cin, cout), jnp.float32) * std
    w_f = w * np.float32(1.0 / np.sqrt(1.0 + BN_EPS))   # gamma=1, var=1
    b_f = jnp.zeros((1, cout), jnp.float32)              # beta=0, mean=0
    return w_f, b_f


def init_params(key, in_channels, out_channels, stack=1):
    levels = len(in_channels)
    n_conv = 2 * (levels - 1)
    keys = jax.random.split(key, levels + stack * n_conv)
    lateral = []
    for i in range(levels):
        w, b = _init_conv_bn(keys[i], in_channels[i], out_channels, 1)
        lateral.append({'w': w[0, 0], 'b': b})            # 1x1 -> (Cin, Cout)
    modules = []
    for s in range(stack):
        convs = []
        for j in range(n_conv):
            w, b = _init_conv_bn(keys[levels + s * n_conv + j],
                                 out_channels, out_channels, 3)
            convs.append({'w': w, 'b': b})
        modules.append({
            'w1': jnp.full((2, levels), 0.5, jnp.float32),        # init=0.5
            'w2': jnp.full((3, levels - 2), 0.5, jnp.float32),
            'convs': convs,
        })
    return {'lateral': lateral, 'bifpn': modules}


# --------------------------------------------------------------------------

if __name__ == "__main__":
    key = jax.random.PRNGKey(0)
    in_channels = [8, 16, 32]
    out_channels = 16
    levels = len(in_channels)
    num_outs = 3
    N = 4                       # folded into 2 grid blocks of 2 batch elements
    spatials = [16, 8, 4]

    k_in, k_par = jax.random.split(key)
    in_keys = jax.random.split(k_in, levels)
    # PyTorch-convention NCHW inputs
    inputs_nchw = [
        jax.random.normal(in_keys[i],
                          (N, in_channels[i], spatials[i], spatials[i]),
                          jnp.float32)
        for i in range(levels)
    ]
    params = init_params(k_par, in_channels, out_channels)

    outs = bifpn_forward(inputs_nchw, params, num_outs)
    for o in outs:
        jax.block_until_ready(o)

    # shape / finiteness / numerical sanity against a pure-JAX reference
    refs = _reference_forward(inputs_nchw, params, num_outs)
    for lvl, (o, r) in enumerate(zip(outs, refs)):
        assert o.shape == (N, out_channels, spatials[lvl], spatials[lvl]), o.shape
        assert bool(jnp.all(jnp.isfinite(o)))
        err = float(jnp.max(jnp.abs(o - r)))
        assert err < 0.25, f"level {lvl}: max abs err {err}"   # bf16-MXU tolerance

    print("KERNEL_OK")
</pallas_src>

<mosaic_0001>
module attributes {stable_mosaic.version = 11 : i64} {
  func.func @kernel(%arg0: i32, %arg1: memref<9xf32, #tpu.memory_space<smem>>, %arg2: memref<1x8x512xf32, #tpu.memory_space<vmem>>, %arg3: memref<1x16x128xf32, #tpu.memory_space<vmem>>, %arg4: memref<1x32x32xf32, #tpu.memory_space<vmem>>, %arg5: memref<16x8xbf16, #tpu.memory_space<vmem>>, %arg6: memref<16x16xbf16, #tpu.memory_space<vmem>>, %arg7: memref<16x32xbf16, #tpu.memory_space<vmem>>, %arg8: memref<5x16x1xf32, #tpu.memory_space<vmem>>, %arg9: memref<2x16x144xbf16, #tpu.memory_space<vmem>>, %arg10: memref<512x128xbf16, #tpu.memory_space<vmem>>, %arg11: memref<128x32xbf16, #tpu.memory_space<vmem>>, %arg12: memref<1x16x768xf32, #tpu.memory_space<vmem>>, %arg13: memref<16x768xbf16, #tpu.memory_space<vmem>>, %arg14: memref<144x512xbf16, #tpu.memory_space<vmem>>) attributes {dimension_semantics = [#tpu.dimension_semantics<parallel>], iteration_bounds = array<i64: 2>, scalar_prefetch = 0 : i64, scratch_operands = 2 : i64, tpu.core_type = #tpu.core_type<tc>, window_params = [{transform_indices = @transform_0, window_bounds = array<i64: 9>}, {transform_indices = @transform_1, window_bounds = array<i64: 1, 8, 512>}, {transform_indices = @transform_2, window_bounds = array<i64: 1, 16, 128>}, {transform_indices = @transform_3, window_bounds = array<i64: 1, 32, 32>}, {pipeline_mode = #tpu.pipeline_mode<synchronous>, transform_indices = @transform_4, window_bounds = array<i64: 16, 8>}, {pipeline_mode = #tpu.pipeline_mode<synchronous>, transform_indices = @transform_5, window_bounds = array<i64: 16, 16>}, {pipeline_mode = #tpu.pipeline_mode<synchronous>, transform_indices = @transform_6, window_bounds = array<i64: 16, 32>}, {pipeline_mode = #tpu.pipeline_mode<synchronous>, transform_indices = @transform_7, window_bounds = array<i64: 5, 16, 1>}, {pipeline_mode = #tpu.pipeline_mode<synchronous>, transform_indices = @transform_8, window_bounds = array<i64: 2, 16, 144>}, {pipeline_mode = #tpu.pipeline_mode<synchronous>, transform_indices = @transform_9, window_bounds = array<i64: 512, 128>}, {pipeline_mode = #tpu.pipeline_mode<synchronous>, transform_indices = @transform_10, window_bounds = array<i64: 128, 32>}, {transform_indices = @transform_11, window_bounds = array<i64: 1, 16, 768>}]} {
    %cst = arith.constant 0.000000e+00 : bf16
    %0 = vector.broadcast %cst : bf16 to vector<16x128xbf16>
    %c0 = arith.constant 0 : index
    %c640 = arith.constant 640 : index
    %1 = vector.load %arg13[%c0, %c640] : memref<16x768xbf16, #tpu.memory_space<vmem>>, vector<16x128xbf16>
    tpu.vector_store %arg13[%c0, %c640], %0 {strides = array<i32>} : memref<16x768xbf16, #tpu.memory_space<vmem>>, vector<16x128xbf16>,
    %c0_0 = arith.constant 0 : index
    %c0_1 = arith.constant 0 : index
    %c0_2 = arith.constant 0 : index
    %2 = vector.load %arg2[%c0_0, %c0_1, %c0_2] : memref<1x8x512xf32, #tpu.memory_space<vmem>>, vector<1x8x512xf32>
    %3 = vector.shape_cast %2 : vector<1x8x512xf32> to vector<8x512xf32>
    %4 = arith.truncf %3 : vector<8x512xf32> to vector<8x512xbf16>
    %c0_3 = arith.constant 0 : index
    %c0_4 = arith.constant 0 : index
    %5 = vector.load %arg5[%c0_3, %c0_4] : memref<16x8xbf16, #tpu.memory_space<vmem>>, vector<16x8xbf16>
    %cst_5 = arith.constant dense<0.000000e+00> : vector<16x512xf32>
    %6 = tpu.matmul %5, %4, %cst_5 {dimension_numbers = #tpu.dot_dimension_numbers<[1], [0], [0], [1], [0, 0, 1, 1], [], []>} : vector<16x8xbf16>, vector<8x512xbf16>, vector<16x512xf32> -> vector<16x512xf32>
    %c0_6 = arith.constant 0 : index
    %c0_7 = arith.constant 0 : index
    %c0_8 = arith.constant 0 : index
    %7 = vector.load %arg8[%c0_6, %c0_7, %c0_8] : memref<5x16x1xf32, #tpu.memory_space<vmem>>, vector<1x16x1xf32>
    %8 = vector.shape_cast %7 : vector<1x16x1xf32> to vector<16x1xf32>
    %9 = vector.broadcast %8 : vector<16x1xf32> to vector<16x512xf32>
    %10 = arith.addf %6, %9 : vector<16x512xf32>
    %11 = arith.negf %10 : vector<16x512xf32>
    %12 = math.exp %11 : vector<16x512xf32>
    %cst_9 = arith.constant 1.000000e+00 : f32
    %13 = vector.broadcast %cst_9 : f32 to vector<16x512xf32>
    %14 = arith.addf %13, %12 : vector<16x512xf32>
    %15 = arith.divf %13, %14 : vector<16x512xf32>
    %16 = arith.mulf %10, %15 : vector<16x512xf32>
    %c0_10 = arith.constant 0 : index
    %c0_11 = arith.constant 0 : index
    %c0_12 = arith.constant 0 : index
    %17 = vector.load %arg3[%c0_10, %c0_11, %c0_12] : memref<1x16x128xf32, #tpu.memory_space<vmem>>, vector<1x16x128xf32>
    %18 = vector.shape_cast %17 : vector<1x16x128xf32> to vector<16x128xf32>
    %19 = arith.truncf %18 : vector<16x128xf32> to vector<16x128xbf16>
    %c0_13 = arith.constant 0 : index
    %c0_14 = arith.constant 0 : index
    %20 = vector.load %arg6[%c0_13, %c0_14] : memref<16x16xbf16, #tpu.memory_space<vmem>>, vector<16x16xbf16>
    %cst_15 = arith.constant dense<0.000000e+00> : vector<16x128xf32>
    %21 = tpu.matmul %20, %19, %cst_15 {dimension_numbers = #tpu.dot_dimension_numbers<[1], [0], [0], [1], [0, 0, 1, 1], [], []>} : vector<16x16xbf16>, vector<16x128xbf16>, vector<16x128xf32> -> vector<16x128xf32>
    %c1 = arith.constant 1 : index
    %c0_16 = arith.constant 0 : index
    %c0_17 = arith.constant 0 : index
    %22 = vector.load %arg8[%c1, %c0_16, %c0_17] : memref<5x16x1xf32, #tpu.memory_space<vmem>>, vector<1x16x1xf32>
    %23 = vector.shape_cast %22 : vector<1x16x1xf32> to vector<16x1xf32>
    %24 = vector.broadcast %23 : vector<16x1xf32> to vector<16x128xf32>
    %25 = arith.addf %21, %24 : vector<16x128xf32>
    %26 = arith.negf %25 : vector<16x128xf32>
    %27 = math.exp %26 : vector<16x128xf32>
    %cst_18 = arith.constant 1.000000e+00 : f32
    %28 = vector.broadcast %cst_18 : f32 to vector<16x128xf32>
    %29 = arith.addf %28, %27 : vector<16x128xf32>
    %30 = arith.divf %28, %29 : vector<16x128xf32>
    %31 = arith.mulf %25, %30 : vector<16x128xf32>
    %c0_19 = arith.constant 0 : index
    %c0_20 = arith.constant 0 : index
    %c0_21 = arith.constant 0 : index
    %32 = vector.load %arg4[%c0_19, %c0_20, %c0_21] : memref<1x32x32xf32, #tpu.memory_space<vmem>>, vector<1x32x32xf32>
    %33 = vector.shape_cast %32 : vector<1x32x32xf32> to vector<32x32xf32>
    %34 = arith.truncf %33 : vector<32x32xf32> to vector<32x32xbf16>
    %c0_22 = arith.constant 0 : index
    %c0_23 = arith.constant 0 : index
    %35 = vector.load %arg7[%c0_22, %c0_23] : memref<16x32xbf16, #tpu.memory_space<vmem>>, vector<16x32xbf16>
    %cst_24 = arith.constant dense<0.000000e+00> : vector<16x32xf32>
    %36 = tpu.matmul %35, %34, %cst_24 {dimension_numbers = #tpu.dot_dimension_numbers<[1], [0], [0], [1], [0, 0, 1, 1], [], []>} : vector<16x32xbf16>, vector<32x32xbf16>, vector<16x32xf32> -> vector<16x32xf32>
    %c2 = arith.constant 2 : index
    %c0_25 = arith.constant 0 : index
    %c0_26 = arith.constant 0 : index
    %37 = vector.load %arg8[%c2, %c0_25, %c0_26] : memref<5x16x1xf32, #tpu.memory_space<vmem>>, vector<1x16x1xf32>
    %38 = vector.shape_cast %37 : vector<1x16x1xf32> to vector<16x1xf32>
    %39 = vector.broadcast %38 : vector<16x1xf32> to vector<16x32xf32>
    %40 = arith.addf %36, %39 : vector<16x32xf32>
    %41 = arith.negf %40 : vector<16x32xf32>
    %42 = math.exp %41 : vector<16x32xf32>
    %cst_27 = arith.constant 1.000000e+00 : f32
    %43 = vector.broadcast %cst_27 : f32 to vector<16x32xf32>
    %44 = arith.addf %43, %42 : vector<16x32xf32>
    %45 = arith.divf %43, %44 : vector<16x32xf32>
    %46 = arith.mulf %40, %45 : vector<16x32xf32>
    %47 = arith.truncf %16 : vector<16x512xf32> to vector<16x512xbf16>
    %c0_28 = arith.constant 0 : index
    %c128 = arith.constant 128 : index
    %48 = vector.load %arg13[%c0_28, %c128] : memref<16x768xbf16, #tpu.memory_space<vmem>>, vector<16x512xbf16>
    tpu.vector_store %arg13[%c0_28, %c128], %47 {strides = array<i32>} : memref<16x768xbf16, #tpu.memory_space<vmem>>, vector<16x512xbf16>,
    %c0_29 = arith.constant 0 : index
    %c129 = arith.constant 129 : index
    %49 = vector.load %arg13[%c0_29, %c129] : memref<16x768xbf16, #tpu.memory_space<vmem>>, vector<16x512xbf16>
    %50 = arith.maximumf %47, %49 : vector<16x512xbf16>
    %c0_30 = arith.constant 0 : index
    %c144 = arith.constant 144 : index
    %51 = vector.load %arg13[%c0_30, %c144] : memref<16x768xbf16, #tpu.memory_space<vmem>>, vector<16x512xbf16>
    %c0_31 = arith.constant 0 : index
    %c145 = arith.constant 145 : index
    %52 = vector.load %arg13[%c0_31, %c145] : memref<16x768xbf16, #tpu.memory_space<vmem>>, vector<16x512xbf16>
    %53 = arith.maximumf %51, %52 : vector<16x512xbf16>
    %54 = arith.maximumf %50, %53 : vector<16x512xbf16>
    %c0_32 = arith.constant 0 : index
    %c0_33 = arith.constant 0 : index
    %55 = vector.load %arg10[%c0_32, %c0_33] : memref<512x128xbf16, #tpu.memory_space<vmem>>, vector<512x128xbf16>
    %cst_34 = arith.constant dense<0.000000e+00> : vector<16x128xf32>
    %56 = tpu.matmul %54, %55, %cst_34 {dimension_numbers = #tpu.dot_dimension_numbers<[1], [0], [0], [1], [0, 0, 1, 1], [], []>} : vector<16x512xbf16>, vector<512x128xbf16>, vector<16x128xf32> -> vector<16x128xf32>
    %c6 = arith.constant 6 : index
    %57 = memref.load %arg1[%c6] : memref<9xf32, #tpu.memory_space<smem>>
    %58 = vector.broadcast %57 : f32 to vector<16x128xf32>
    %59 = arith.mulf %58, %31 : vector<16x128xf32>
    %c7 = arith.constant 7 : index
    %60 = memref.load %arg1[%c7] : memref<9xf32, #tpu.memory_space<smem>>
    %61 = vector.broadcast %60 : f32 to vector<16x128xf32>
    %62 = arith.mulf %61, %56 : vector<16x128xf32>
    %63 = arith.addf %59, %62 : vector<16x128xf32>
    %c8 = arith.constant 8 : index
    %64 = memref.load %arg1[%c8] : memref<9xf32, #tpu.memory_space<smem>>
    %65 = vector.broadcast %64 : f32 to vector<16x128xf32>
    %66 = arith.mulf %65, %31 : vector<16x128xf32>
    %67 = arith.addf %63, %66 : vector<16x128xf32>
    %68 = arith.truncf %67 : vector<16x128xf32> to vector<16x128xbf16>
    %c0_35 = arith.constant 0 : index
    %c128_36 = arith.constant 128 : index
    %69 = vector.load %arg13[%c0_35, %c128_36] : memref<16x768xbf16, #tpu.memory_space<vmem>>, vector<16x128xbf16>
    tpu.vector_store %arg13[%c0_35, %c128_36], %68 {strides = array<i32>} : memref<16x768xbf16, #tpu.memory_space<vmem>>, vector<16x128xbf16>,
    %c0_37 = arith.constant 0 : index
    %c119 = arith.constant 119 : index
    %70 = vector.load %arg13[%c0_37, %c119] : memref<16x768xbf16, #tpu.memory_space<vmem>>, vector<16x128xbf16>
    %71 = tpu.iota {dimensions = array<i32: 1>} : vector<16x128xi32>
    %c7_i32 = arith.constant 7 : i32
    %72 = vector.broadcast %c7_i32 : i32 to vector<16x128xi32>
    %73 = arith.andi %71, %72 : vector<16x128xi32>
    %c3_i32 = arith.constant 3 : i32
    %74 = vector.broadcast %c3_i32 : i32 to vector<16x128xi32>
    %75 = arith.shrsi %71, %74 : vector<16x128xi32>
    %c7_i32_38 = arith.constant 7 : i32
    %76 = vector.broadcast %c7_i32_38 : i32 to vector<16x128xi32>
    %77 = arith.andi %75, %76 : vector<16x128xi32>
    %c0_i32 = arith.constant 0 : i32
    %78 = vector.broadcast %c0_i32 : i32 to vector<16x128xi32>
    %79 = arith.cmpi eq, %73, %78 : vector<16x128xi32>
    %c7_i32_39 = arith.constant 7 : i32
    %80 = vector.broadcast %c7_i32_39 : i32 to vector<16x128xi32>
    %81 = arith.cmpi eq, %73, %80 : vector<16x128xi32>
    %c0_i32_40 = arith.constant 0 : i32
    %82 = vector.broadcast %c0_i32_40 : i32 to vector<16x128xi32>
    %83 = arith.cmpi eq, %77, %82 : vector<16x128xi32>
    %c7_i32_41 = arith.constant 7 : i32
    %84 = vector.broadcast %c7_i32_41 : i32 to vector<16x128xi32>
    %85 = arith.cmpi eq, %77, %84 : vector<16x128xi32>
    %86 = arith.ori %83, %79 : vector<16x128xi1>
    %cst_42 = arith.constant 0.000000e+00 : bf16
    %87 = vector.broadcast %cst_42 : bf16 to vector<16x128xbf16>
    %88 = arith.select %86, %87, %70 : vector<16x128xi1>, vector<16x128xbf16>
    %c0_43 = arith.constant 0 : index
    %c0_44 = arith.constant 0 : index
    %89 = vector.load %arg14[%c0_43, %c0_44] : memref<144x512xbf16, #tpu.memory_space<vmem>>, vector<16x128xbf16>
    tpu.vector_store %arg14[%c0_43, %c0_44], %88 {strides = array<i32>} : memref<144x512xbf16, #tpu.memory_space<vmem>>, vector<16x128xbf16>,
    %c0_45 = arith.constant 0 : index
    %c120 = arith.constant 120 : index
    %90 = vector.load %arg13[%c0_45, %c120] : memref<16x768xbf16, #tpu.memory_space<vmem>>, vector<16x128xbf16>
    %cst_46 = arith.constant 0.000000e+00 : bf16
    %91 = vector.broadcast %cst_46 : bf16 to vector<16x128xbf16>
    %92 = arith.select %83, %91, %90 : vector<16x128xi1>, vector<16x128xbf16>
    %c16 = arith.constant 16 : index
    %c0_47 = arith.constant 0 : index
    %93 = vector.load %arg14[%c16, %c0_47] : memref<144x512xbf16, #tpu.memory_space<vmem>>, vector<16x128xbf16>
    tpu.vector_store %arg14[%c16, %c0_47], %92 {strides = array<i32>} : memref<144x512xbf16, #tpu.memory_space<vmem>>, vector<16x128xbf16>,
    %c0_48 = arith.constant 0 : index
    %c121 = arith.constant 121 : index
    %94 = vector.load %arg13[%c0_48, %c121] : memref<16x768xbf16, #tpu.memory_space<vmem>>, vector<16x128xbf16>
    %95 = arith.ori %83, %81 : vector<16x128xi1>
    %cst_49 = arith.constant 0.000000e+00 : bf16
    %96 = vector.broadcast %cst_49 : bf16 to vector<16x128xbf16>
    %97 = arith.select %95, %96, %94 : vector<16x128xi1>, vector<16x128xbf16>
    %c32 = arith.constant 32 : index
    %c0_50 = arith.constant 0 : index
    %98 = vector.load %arg14[%c32, %c0_50] : memref<144x512xbf16, #tpu.memory_space<vmem>>, vector<16x128xbf16>
    tpu.vector_store %arg14[%c32, %c0_50], %97 {strides = array<i32>} : memref<144x512xbf16, #tpu.memory_space<vmem>>, vector<16x128xbf16>,
    %c0_51 = arith.constant 0 : index
    %c127 = arith.constant 127 : index
    %99 = vector.load %arg13[%c0_51, %c127] : memref<16x768xbf16, #tpu.memory_space<vmem>>, vector<16x128xbf16>
    %cst_52 = arith.constant 0.000000e+00 : bf16
    %100 = vector.broadcast %cst_52 : bf16 to vector<16x128xbf16>
    %101 = arith.select %79, %100, %99 : vector<16x128xi1>, vector<16x128xbf16>
    %c48 = arith.constant 48 : index
    %c0_53 = arith.constant 0 : index
    %102 = vector.load %arg14[%c48, %c0_53] : memref<144x512xbf16, #tpu.memory_space<vmem>>, vector<16x128xbf16>
    tpu.vector_store %arg14[%c48, %c0_53], %101 {strides = array<i32>} : memref<144x512xbf16, #tpu.memory_space<vmem>>, vector<16x128xbf16>,
    %c0_54 = arith.constant 0 : index
    %c128_55 = arith.constant 128 : index
    %103 = vector.load %arg13[%c0_54, %c128_55] : memref<16x768xbf16, #tpu.memory_space<vmem>>, vector<16x128xbf16>
    %c64 = arith.constant 64 : index
    %c0_56 = arith.constant 0 : index
    %104 = vector.load %arg14[%c64, %c0_56] : memref<144x512xbf16, #tpu.memory_space<vmem>>, vector<16x128xbf16>
    tpu.vector_store %arg14[%c64, %c0_56], %103 {strides = array<i32>} : memref<144x512xbf16, #tpu.memory_space<vmem>>, vector<16x128xbf16>,
    %c0_57 = arith.constant 0 : index
    %c129_58 = arith.constant 129 : index
    %105 = vector.load %arg13[%c0_57, %c129_58] : memref<16x768xbf16, #tpu.memory_space<vmem>>, vector<16x128xbf16>
    %cst_59 = arith.constant 0.000000e+00 : bf16
    %106 = vector.broadcast %cst_59 : bf16 to vector<16x128xbf16>
    %107 = arith.select %81, %106, %105 : vector<16x128xi1>, vector<16x128xbf16>
    %c80 = arith.constant 80 : index
    %c0_60 = arith.constant 0 : index
    %108 = vector.load %arg14[%c80, %c0_60] : memref<144x512xbf16, #tpu.memory_space<vmem>>, vector<16x128xbf16>
    tpu.vector_store %arg14[%c80, %c0_60], %107 {strides = array<i32>} : memref<144x512xbf16, #tpu.memory_space<vmem>>, vector<16x128xbf16>,
    %c0_61 = arith.constant 0 : index
    %c135 = arith.constant 135 : index
    %109 = vector.load %arg13[%c0_61, %c135] : memref<16x768xbf16, #tpu.memory_space<vmem>>, vector<16x128xbf16>
    %110 = arith.ori %85, %79 : vector<16x128xi1>
    %cst_62 = arith.constant 0.000000e+00 : bf16
    %111 = vector.broadcast %cst_62 : bf16 to vector<16x128xbf16>
    %112 = arith.select %110, %111, %109 : vector<16x128xi1>, vector<16x128xbf16>
    %c96 = arith.constant 96 : index
    %c0_63 = arith.constant 0 : index
    %113 = vector.load %arg14[%c96, %c0_63] : memref<144x512xbf16, #tpu.memory_space<vmem>>, vector<16x128xbf16>
    tpu.vector_store %arg14[%c96, %c0_63], %112 {strides = array<i32>} : memref<144x512xbf16, #tpu.memory_space<vmem>>, vector<16x128xbf16>,
    %c0_64 = arith.constant 0 : index
    %c136 = arith.constant 136 : index
    %114 = vector.load %arg13[%c0_64, %c136] : memref<16x768xbf16, #tpu.memory_space<vmem>>, vector<16x128xbf16>
    %cst_65 = arith.constant 0.000000e+00 : bf16
    %115 = vector.broadcast %cst_65 : bf16 to vector<16x128xbf16>
    %116 = arith.select %85, %115, %114 : vector<16x128xi1>, vector<16x128xbf16>
    %c112 = arith.constant 112 : index
    %c0_66 = arith.constant 0 : index
    %117 = vector.load %arg14[%c112, %c0_66] : memref<144x512xbf16, #tpu.memory_space<vmem>>, vector<16x128xbf16>
    tpu.vector_store %arg14[%c112, %c0_66], %116 {strides = array<i32>} : memref<144x512xbf16, #tpu.memory_space<vmem>>, vector<16x128xbf16>,
    %c0_67 = arith.constant 0 : index
    %c137 = arith.constant 137 : index
    %118 = vector.load %arg13[%c0_67, %c137] : memref<16x768xbf16, #tpu.memory_space<vmem>>, vector<16x128xbf16>
    %119 = arith.ori %85, %81 : vector<16x128xi1>
    %cst_68 = arith.constant 0.000000e+00 : bf16
    %120 = vector.broadcast %cst_68 : bf16 to vector<16x128xbf16>
    %121 = arith.select %119, %120, %118 : vector<16x128xi1>, vector<16x128xbf16>
    %c128_69 = arith.constant 128 : index
    %c0_70 = arith.constant 0 : index
    %122 = vector.load %arg14[%c128_69, %c0_70] : memref<144x512xbf16, #tpu.memory_space<vmem>>, vector<16x128xbf16>
    tpu.vector_store %arg14[%c128_69, %c0_70], %121 {strides = array<i32>} : memref<144x512xbf16, #tpu.memory_space<vmem>>, vector<16x128xbf16>,
    %c0_71 = arith.constant 0 : index
    %c0_72 = arith.constant 0 : index
    %c0_73 = arith.constant 0 : index
    %123 = vector.load %arg9[%c0_71, %c0_72, %c0_73] : memref<2x16x144xbf16, #tpu.memory_space<vmem>>, vector<1x16x144xbf16>
    %124 = vector.shape_cast %123 : vector<1x16x144xbf16> to vector<16x144xbf16>
    %c0_74 = arith.constant 0 : index
    %c0_75 = arith.constant 0 : index
    %125 = vector.load %arg14[%c0_74, %c0_75] : memref<144x512xbf16, #tpu.memory_space<vmem>>, vector<144x128xbf16>
    %cst_76 = arith.constant dense<0.000000e+00> : vector<16x128xf32>
    %126 = tpu.matmul %124, %125, %cst_76 {dimension_numbers = #tpu.dot_dimension_numbers<[1], [0], [0], [1], [0, 0, 1, 1], [], []>} : vector<16x144xbf16>, vector<144x128xbf16>, vector<16x128xf32> -> vector<16x128xf32>
    %c3 = arith.constant 3 : index
    %c0_77 = arith.constant 0 : index
    %c0_78 = arith.constant 0 : index
    %127 = vector.load %arg8[%c3, %c0_77, %c0_78] : memref<5x16x1xf32, #tpu.memory_space<vmem>>, vector<1x16x1xf32>
    %128 = vector.shape_cast %127 : vector<1x16x1xf32> to vector<16x1xf32>
    %129 = vector.broadcast %128 : vector<16x1xf32> to vector<16x128xf32>
    %130 = arith.addf %126, %129 : vector<16x128xf32>
    %131 = arith.negf %130 : vector<16x128xf32>
    %132 = math.exp %131 : vector<16x128xf32>
    %cst_79 = arith.constant 1.000000e+00 : f32
    %133 = vector.broadcast %cst_79 : f32 to vector<16x128xf32>
    %134 = arith.addf %133, %132 : vector<16x128xf32>
    %135 = arith.divf %133, %134 : vector<16x128xf32>
    %136 = arith.mulf %130, %135 : vector<16x128xf32>
    %137 = arith.truncf %136 : vector<16x128xf32> to vector<16x128xbf16>
    %c0_80 = arith.constant 0 : index
    %c128_81 = arith.constant 128 : index
    %138 = vector.load %arg13[%c0_80, %c128_81] : memref<16x768xbf16, #tpu.memory_space<vmem>>, vector<16x128xbf16>
    tpu.vector_store %arg13[%c0_80, %c128_81], %137 {strides = array<i32>} : memref<16x768xbf16, #tpu.memory_space<vmem>>, vector<16x128xbf16>,
    %c0_82 = arith.constant 0 : index
    %c129_83 = arith.constant 129 : index
    %139 = vector.load %arg13[%c0_82, %c129_83] : memref<16x768xbf16, #tpu.memory_space<vmem>>, vector<16x128xbf16>
    %140 = arith.maximumf %137, %139 : vector<16x128xbf16>
    %c0_84 = arith.constant 0 : index
    %c136_85 = arith.constant 136 : index
    %141 = vector.load %arg13[%c0_84, %c136_85] : memref<16x768xbf16, #tpu.memory_space<vmem>>, vector<16x128xbf16>
    %c0_86 = arith.constant 0 : index
    %c137_87 = arith.constant 137 : index
    %142 = vector.load %arg13[%c0_86, %c137_87] : memref<16x768xbf16, #tpu.memory_space<vmem>>, vector<16x128xbf16>
    %143 = arith.maximumf %141, %142 : vector<16x128xbf16>
    %144 = arith.maximumf %140, %143 : vector<16x128xbf16>
    %c0_88 = arith.constant 0 : index
    %c0_89 = arith.constant 0 : index
    %145 = vector.load %arg11[%c0_88, %c0_89] : memref<128x32xbf16, #tpu.memory_space<vmem>>, vector<128x32xbf16>
    %cst_90 = arith.constant dense<0.000000e+00> : vector<16x32xf32>
    %146 = tpu.matmul %144, %145, %cst_90 {dimension_numbers = #tpu.dot_dimension_numbers<[1], [0], [0], [1], [0, 0, 1, 1], [], []>} : vector<16x128xbf16>, vector<128x32xbf16>, vector<16x32xf32> -> vector<16x32xf32>
    %c2_91 = arith.constant 2 : index
    %147 = memref.load %arg1[%c2_91] : memref<9xf32, #tpu.memory_space<smem>>
    %148 = vector.broadcast %147 : f32 to vector<16x32xf32>
    %149 = arith.mulf %148, %46 : vector<16x32xf32>
    %c5 = arith.constant 5 : index
    %150 = memref.load %arg1[%c5] : memref<9xf32, #tpu.memory_space<smem>>
    %151 = vector.broadcast %150 : f32 to vector<16x32xf32>
    %152 = arith.mulf %151, %146 : vector<16x32xf32>
    %153 = arith.addf %149, %152 : vector<16x32xf32>
    %154 = arith.truncf %153 : vector<16x32xf32> to vector<16x32xbf16>
    %c0_92 = arith.constant 0 : index
    %c128_93 = arith.constant 128 : index
    %155 = vector.load %arg13[%c0_92, %c128_93] : memref<16x768xbf16, #tpu.memory_space<vmem>>, vector<16x32xbf16>
    tpu.vector_store %arg13[%c0_92, %c128_93], %154 {strides = array<i32>} : memref<16x768xbf16, #tpu.memory_space<vmem>>, vector<16x32xbf16>,
    %c0_94 = arith.constant 0 : index
    %c123 = arith.constant 123 : index
    %156 = vector.load %arg13[%c0_94, %c123] : memref<16x768xbf16, #tpu.memory_space<vmem>>, vector<16x32xbf16>
    %157 = tpu.iota {dimensions = array<i32: 1>} : vector<16x32xi32>
    %c3_i32_95 = arith.constant 3 : i32
    %158 = vector.broadcast %c3_i32_95 : i32 to vector<16x32xi32>
    %159 = arith.andi %157, %158 : vector<16x32xi32>
    %c2_i32 = arith.constant 2 : i32
    %160 = vector.broadcast %c2_i32 : i32 to vector<16x32xi32>
    %161 = arith.shrsi %157, %160 : vector<16x32xi32>
    %c3_i32_96 = arith.constant 3 : i32
    %162 = vector.broadcast %c3_i32_96 : i32 to vector<16x32xi32>
    %163 = arith.andi %161, %162 : vector<16x32xi32>
    %c0_i32_97 = arith.constant 0 : i32
    %164 = vector.broadcast %c0_i32_97 : i32 to vector<16x32xi32>
    %165 = arith.cmpi eq, %159, %164 : vector<16x32xi32>
    %c3_i32_98 = arith.constant 3 : i32
    %166 = vector.broadcast %c3_i32_98 : i32 to vector<16x32xi32>
    %167 = arith.cmpi eq, %159, %166 : vector<16x32xi32>
    %c0_i32_99 = arith.constant 0 : i32
    %168 = vector.broadcast %c0_i32_99 : i32 to vector<16x32xi32>
    %169 = arith.cmpi eq, %163, %168 : vector<16x32xi32>
    %c3_i32_100 = arith.constant 3 : i32
    %170 = vector.broadcast %c3_i32_100 : i32 to vector<16x32xi32>
    %171 = arith.cmpi eq, %163, %170 : vector<16x32xi32>
    %172 = arith.ori %169, %165 : vector<16x32xi1>
    %cst_101 = arith.constant 0.000000e+00 : bf16
    %173 = vector.broadcast %cst_101 : bf16 to vector<16x32xbf16>
    %174 = arith.select %172, %173, %156 : vector<16x32xi1>, vector<16x32xbf16>
    %c0_102 = arith.constant 0 : index
    %c0_103 = arith.constant 0 : index
    %175 = vector.load %arg14[%c0_102, %c0_103] : memref<144x512xbf16, #tpu.memory_space<vmem>>, vector<16x32xbf16>
    tpu.vector_store %arg14[%c0_102, %c0_103], %174 {strides = array<i32>} : memref<144x512xbf16, #tpu.memory_space<vmem>>, vector<16x32xbf16>,
    %c0_104 = arith.constant 0 : index
    %c124 = arith.constant 124 : index
    %176 = vector.load %arg13[%c0_104, %c124] : memref<16x768xbf16, #tpu.memory_space<vmem>>, vector<16x32xbf16>
    %cst_105 = arith.constant 0.000000e+00 : bf16
    %177 = vector.broadcast %cst_105 : bf16 to vector<16x32xbf16>
    %178 = arith.select %169, %177, %176 : vector<16x32xi1>, vector<16x32xbf16>
    %c16_106 = arith.constant 16 : index
    %c0_107 = arith.constant 0 : index
    %179 = vector.load %arg14[%c16_106, %c0_107] : memref<144x512xbf16, #tpu.memory_space<vmem>>, vector<16x32xbf16>
    tpu.vector_store %arg14[%c16_106, %c0_107], %178 {strides = array<i32>} : memref<144x512xbf16, #tpu.memory_space<vmem>>, vector<16x32xbf16>,
    %c0_108 = arith.constant 0 : index
    %c125 = arith.constant 125 : index
    %180 = vector.load %arg13[%c0_108, %c125] : memref<16x768xbf16, #tpu.memory_space<vmem>>, vector<16x32xbf16>
    %181 = arith.ori %169, %167 : vector<16x32xi1>
    %cst_109 = arith.constant 0.000000e+00 : bf16
    %182 = vector.broadcast %cst_109 : bf16 to vector<16x32xbf16>
    %183 = arith.select %181, %182, %180 : vector<16x32xi1>, vector<16x32xbf16>
    %c32_110 = arith.constant 32 : index
    %c0_111 = arith.constant 0 : index
    %184 = vector.load %arg14[%c32_110, %c0_111] : memref<144x512xbf16, #tpu.memory_space<vmem>>, vector<16x32xbf16>
    tpu.vector_store %arg14[%c32_110, %c0_111], %183 {strides = array<i32>} : memref<144x512xbf16, #tpu.memory_space<vmem>>, vector<16x32xbf16>,
    %c0_112 = arith.constant 0 : index
    %c127_113 = arith.constant 127 : index
    %185 = vector.load %arg13[%c0_112, %c127_113] : memref<16x768xbf16, #tpu.memory_space<vmem>>, vector<16x32xbf16>
    %cst_114 = arith.constant 0.000000e+00 : bf16
    %186 = vector.broadcast %cst_114 : bf16 to vector<16x32xbf16>
    %187 = arith.select %165, %186, %185 : vector<16x32xi1>, vector<16x32xbf16>
    %c48_115 = arith.constant 48 : index
    %c0_116 = arith.constant 0 : index
    %188 = vector.load %arg14[%c48_115, %c0_116] : memref<144x512xbf16, #tpu.memory_space<vmem>>, vector<16x32xbf16>
    tpu.vector_store %arg14[%c48_115, %c0_116], %187 {strides = array<i32>} : memref<144x512xbf16, #tpu.memory_space<vmem>>, vector<16x32xbf16>,
    %c0_117 = arith.constant 0 : index
    %c128_118 = arith.constant 128 : index
    %189 = vector.load %arg13[%c0_117, %c128_118] : memref<16x768xbf16, #tpu.memory_space<vmem>>, vector<16x32xbf16>
    %c64_119 = arith.constant 64 : index
    %c0_120 = arith.constant 0 : index
    %190 = vector.load %arg14[%c64_119, %c0_120] : memref<144x512xbf16, #tpu.memory_space<vmem>>, vector<16x32xbf16>
    tpu.vector_store %arg14[%c64_119, %c0_120], %189 {strides = array<i32>} : memref<144x512xbf16, #tpu.memory_space<vmem>>, vector<16x32xbf16>,
    %c0_121 = arith.constant 0 : index
    %c129_122 = arith.constant 129 : index
    %191 = vector.load %arg13[%c0_121, %c129_122] : memref<16x768xbf16, #tpu.memory_space<vmem>>, vector<16x32xbf16>
    %cst_123 = arith.constant 0.000000e+00 : bf16
    %192 = vector.broadcast %cst_123 : bf16 to vector<16x32xbf16>
    %193 = arith.select %167, %192, %191 : vector<16x32xi1>, vector<16x32xbf16>
    %c80_124 = arith.constant 80 : index
    %c0_125 = arith.constant 0 : index
    %194 = vector.load %arg14[%c80_124, %c0_125] : memref<144x512xbf16, #tpu.memory_space<vmem>>, vector<16x32xbf16>
    tpu.vector_store %arg14[%c80_124, %c0_125], %193 {strides = array<i32>} : memref<144x512xbf16, #tpu.memory_space<vmem>>, vector<16x32xbf16>,
    %c0_126 = arith.constant 0 : index
    %c131 = arith.constant 131 : index
    %195 = vector.load %arg13[%c0_126, %c131] : memref<16x768xbf16, #tpu.memory_space<vmem>>, vector<16x32xbf16>
    %196 = arith.ori %171, %165 : vector<16x32xi1>
    %cst_127 = arith.constant 0.000000e+00 : bf16
    %197 = vector.broadcast %cst_127 : bf16 to vector<16x32xbf16>
    %198 = arith.select %196, %197, %195 : vector<16x32xi1>, vector<16x32xbf16>
    %c96_128 = arith.constant 96 : index
    %c0_129 = arith.constant 0 : index
    %199 = vector.load %arg14[%c96_128, %c0_129] : memref<144x512xbf16, #tpu.memory_space<vmem>>, vector<16x32xbf16>
    tpu.vector_store %arg14[%c96_128, %c0_129], %198 {strides = array<i32>} : memref<144x512xbf16, #tpu.memory_space<vmem>>, vector<16x32xbf16>,
    %c0_130 = arith.constant 0 : index
    %c132 = arith.constant 132 : index
    %200 = vector.load %arg13[%c0_130, %c132] : memref<16x768xbf16, #tpu.memory_space<vmem>>, vector<16x32xbf16>
    %cst_131 = arith.constant 0.000000e+00 : bf16
    %201 = vector.broadcast %cst_131 : bf16 to vector<16x32xbf16>
    %202 = arith.select %171, %201, %200 : vector<16x32xi1>, vector<16x32xbf16>
    %c112_132 = arith.constant 112 : index
    %c0_133 = arith.constant 0 : index
    %203 = vector.load %arg14[%c112_132, %c0_133] : memref<144x512xbf16, #tpu.memory_space<vmem>>, vector<16x32xbf16>
    tpu.vector_store %arg14[%c112_132, %c0_133], %202 {strides = array<i32>} : memref<144x512xbf16, #tpu.memory_space<vmem>>, vector<16x32xbf16>,
    %c0_134 = arith.constant 0 : index
    %c133 = arith.constant 133 : index
    %204 = vector.load %arg13[%c0_134, %c133] : memref<16x768xbf16, #tpu.memory_space<vmem>>, vector<16x32xbf16>
    %205 = arith.ori %171, %167 : vector<16x32xi1>
    %cst_135 = arith.constant 0.000000e+00 : bf16
    %206 = vector.broadcast %cst_135 : bf16 to vector<16x32xbf16>
    %207 = arith.select %205, %206, %204 : vector<16x32xi1>, vector<16x32xbf16>
    %c128_136 = arith.constant 128 : index
    %c0_137 = arith.constant 0 : index
    %208 = vector.load %arg14[%c128_136, %c0_137] : memref<144x512xbf16, #tpu.memory_space<vmem>>, vector<16x32xbf16>
    tpu.vector_store %arg14[%c128_136, %c0_137], %207 {strides = array<i32>} : memref<144x512xbf16, #tpu.memory_space<vmem>>, vector<16x32xbf16>,
    %c1_138 = arith.constant 1 : index
    %c0_139 = arith.constant 0 : index
    %c0_140 = arith.constant 0 : index
    %209 = vector.load %arg9[%c1_138, %c0_139, %c0_140] : memref<2x16x144xbf16, #tpu.memory_space<vmem>>, vector<1x16x144xbf16>
    %210 = vector.shape_cast %209 : vector<1x16x144xbf16> to vector<16x144xbf16>
    %c0_141 = arith.constant 0 : index
    %c0_142 = arith.constant 0 : index
    %211 = vector.load %arg14[%c0_141, %c0_142] : memref<144x512xbf16, #tpu.memory_space<vmem>>, vector<144x32xbf16>
    %cst_143 = arith.constant dense<0.000000e+00> : vector<16x32xf32>
    %212 = tpu.matmul %210, %211, %cst_143 {dimension_numbers = #tpu.dot_dimension_numbers<[1], [0], [0], [1], [0, 0, 1, 1], [], []>} : vector<16x144xbf16>, vector<144x32xbf16>, vector<16x32xf32> -> vector<16x32xf32>
    %c4 = arith.constant 4 : index
    %c0_144 = arith.constant 0 : index
    %c0_145 = arith.constant 0 : index
    %213 = vector.load %arg8[%c4, %c0_144, %c0_145] : memref<5x16x1xf32, #tpu.memory_space<vmem>>, vector<1x16x1xf32>
    %214 = vector.shape_cast %213 : vector<1x16x1xf32> to vector<16x1xf32>
    %215 = vector.broadcast %214 : vector<16x1xf32> to vector<16x32xf32>
    %216 = arith.addf %212, %215 : vector<16x32xf32>
    %217 = arith.negf %216 : vector<16x32xf32>
    %218 = math.exp %217 : vector<16x32xf32>
    %cst_146 = arith.constant 1.000000e+00 : f32
    %219 = vector.broadcast %cst_146 : f32 to vector<16x32xf32>
    %220 = arith.addf %219, %218 : vector<16x32xf32>
    %221 = arith.divf %219, %220 : vector<16x32xf32>
    %222 = arith.mulf %216, %221 : vector<16x32xf32>
    %c0_147 = arith.constant 0 : index
    %c0_148 = arith.constant 0 : index
    %c0_149 = arith.constant 0 : index
    %223 = vector.load %arg12[%c0_147, %c0_148, %c0_149] : memref<1x16x768xf32, #tpu.memory_space<vmem>>, vector<1x16x512xf32>
    %224 = vector.shape_cast %223 : vector<1x16x512xf32> to vector<16x512xf32>
    %225 = vector.shape_cast %16 : vector<16x512xf32> to vector<1x16x512xf32>
    tpu.vector_store %arg12[%c0_147, %c0_148, %c0_149], %225 {strides = array<i32>} : memref<1x16x768xf32, #tpu.memory_space<vmem>>, vector<1x16x512xf32>,
    %c0_150 = arith.constant 0 : index
    %c0_151 = arith.constant 0 : index
    %c512 = arith.constant 512 : index
    %226 = vector.load %arg12[%c0_150, %c0_151, %c512] : memref<1x16x768xf32, #tpu.memory_space<vmem>>, vector<1x16x128xf32>
    %227 = vector.shape_cast %226 : vector<1x16x128xf32> to vector<16x128xf32>
    %228 = vector.shape_cast %136 : vector<16x128xf32> to vector<1x16x128xf32>
    tpu.vector_store %arg12[%c0_150, %c0_151, %c512], %228 {strides = array<i32>} : memref<1x16x768xf32, #tpu.memory_space<vmem>>, vector<1x16x128xf32>,
    %c0_152 = arith.constant 0 : index
    %c0_153 = arith.constant 0 : index
    %c640_154 = arith.constant 640 : index
    %229 = vector.load %arg12[%c0_152, %c0_153, %c640_154] : memref<1x16x768xf32, #tpu.memory_space<vmem>>, vector<1x16x32xf32>
    %230 = vector.shape_cast %229 : vector<1x16x32xf32> to vector<16x32xf32>
    %231 = vector.shape_cast %222 : vector<16x32xf32> to vector<1x16x32xf32>
    tpu.vector_store %arg12[%c0_152, %c0_153, %c640_154], %231 {strides = array<i32>} : memref<1x16x768xf32, #tpu.memory_space<vmem>>, vector<1x16x32xf32>,
    return
  }
  func.func @transform_0(%arg0: i32) -> i32 {
    %c0_i32 = arith.constant 0 : i32
    %c0_i32_0 = arith.constant 0 : i32
    return %c0_i32 : i32
  }
  func.func @transform_1(%arg0: i32) -> (i32, i32, i32) {
    %c0_i32 = arith.constant 0 : i32
    %c0_i32_0 = arith.constant 0 : i32
    %c0_i32_1 = arith.constant 0 : i32
    return %arg0, %c0_i32, %c0_i32_0 : i32, i32, i32
  }
  func.func @transform_2(%arg0: i32) -> (i32, i32, i32) {
    %c0_i32 = arith.constant 0 : i32
    %c0_i32_0 = arith.constant 0 : i32
    %c0_i32_1 = arith.constant 0 : i32
    return %arg0, %c0_i32, %c0_i32_0 : i32, i32, i32
  }
  func.func @transform_3(%arg0: i32) -> (i32, i32, i32) {
    %c0_i32 = arith.constant 0 : i32
    %c0_i32_0 = arith.constant 0 : i32
    %c0_i32_1 = arith.constant 0 : i32
    return %arg0, %c0_i32, %c0_i32_0 : i32, i32, i32
  }
  func.func @transform_4(%arg0: i32) -> (i32, i32) {
    %c0_i32 = arith.constant 0 : i32
    %c0_i32_0 = arith.constant 0 : i32
    %c0_i32_1 = arith.constant 0 : i32
    return %c0_i32, %c0_i32_0 : i32, i32
  }
  func.func @transform_5(%arg0: i32) -> (i32, i32) {
    %c0_i32 = arith.constant 0 : i32
    %c0_i32_0 = arith.constant 0 : i32
    %c0_i32_1 = arith.constant 0 : i32
    return %c0_i32, %c0_i32_0 : i32, i32
  }
  func.func @transform_6(%arg0: i32) -> (i32, i32) {
    %c0_i32 = arith.constant 0 : i32
    %c0_i32_0 = arith.constant 0 : i32
    %c0_i32_1 = arith.constant 0 : i32
    return %c0_i32, %c0_i32_0 : i32, i32
  }
  func.func @transform_7(%arg0: i32) -> (i32, i32, i32) {
    %c0_i32 = arith.constant 0 : i32
    %c0_i32_0 = arith.constant 0 : i32
    %c0_i32_1 = arith.constant 0 : i32
    %c0_i32_2 = arith.constant 0 : i32
    return %c0_i32, %c0_i32_0, %c0_i32_1 : i32, i32, i32
  }
  func.func @transform_8(%arg0: i32) -> (i32, i32, i32) {
    %c0_i32 = arith.constant 0 : i32
    %c0_i32_0 = arith.constant 0 : i32
    %c0_i32_1 = arith.constant 0 : i32
    %c0_i32_2 = arith.constant 0 : i32
    return %c0_i32, %c0_i32_0, %c0_i32_1 : i32, i32, i32
  }
  func.func @transform_9(%arg0: i32) -> (i32, i32) {
    %c0_i32 = arith.constant 0 : i32
    %c0_i32_0 = arith.constant 0 : i32
    %c0_i32_1 = arith.constant 0 : i32
    return %c0_i32, %c0_i32_0 : i32, i32
  }
  func.func @transform_10(%arg0: i32) -> (i32, i32) {
    %c0_i32 = arith.constant 0 : i32
    %c0_i32_0 = arith.constant 0 : i32
    %c0_i32_1 = arith.constant 0 : i32
    return %c0_i32, %c0_i32_0 : i32, i32
  }
  func.func @transform_11(%arg0: i32) -> (i32, i32, i32) {
    %c0_i32 = arith.constant 0 : i32
    %c0_i32_0 = arith.constant 0 : i32
    %c0_i32_1 = arith.constant 0 : i32
    return %arg0, %c0_i32, %c0_i32_0 : i32, i32, i32
  }
}

</mosaic_0001>

<bundles_post_ra>
// kernel: tpu_custom_call.1
= control target key start
LH: loop header
LB: loop body
LE: loop exit
PB: predicated region body
PF: predicated region fallthrough
CT: control target
= control target key end

     0   :  { %s3487_s0 = inlined_call_operand.hbm [shape: f32[9], index: 0, kind: input, shape index: {}]   ;;  %s3488_s1 = inlined_call_operand.vmem [shape: f32[2,8,512], index: 1, kind: input, shape index: {}]   ;;  %s3489_s2 = inlined_call_operand.vmem [shape: f32[2,16,128], index: 2, kind: input, shape index: {}]   ;;  %s3490_s3 = inlined_call_operand.vmem [shape: f32[2,32,32], index: 3, kind: input, shape index: {}]   ;;  %s3491_s4 = inlined_call_operand.vmem [shape: bf16[16,8], index: 4, kind: input, shape index: {}]   ;;  %s3492_s5 = inlined_call_operand.hbm [shape: bf16[16,16], index: 5, kind: input, shape index: {}]   ;;  %s3493_s6 = inlined_call_operand.hbm [shape: bf16[16,32], index: 6, kind: input, shape index: {}]   ;;  %s3494_s7 = inlined_call_operand.vmem [shape: f32[5,16,1], index: 7, kind: input, shape index: {}]   ;;  %s3495_s8 = inlined_call_operand.vmem [shape: bf16[2,16,144], index: 8, kind: input, shape index: {}]   ;;  %s3496_s9 = inlined_call_operand.hbm [shape: bf16[512,128], index: 9, kind: input, shape index: {}]   ;;  %s3497_s10 = inlined_call_operand.vmem [shape: bf16[128,32], index: 10, kind: input, shape index: {}]   ;;  %s3498_s11 = inlined_call_operand.hbm [shape: f32[2,16,768], index: 11, kind: output, shape index: {}]  }
   0x1   :  { %3509 = sst [smem:[#allocation23_spill]] %s3498_s11 }
   0x2   :  { %16 = vsyncpa [#allocation7], 0 }
   0x3   :  { %17 = vsyncpa [#allocation5], 0 }
   0x4   :  { %18 = vsyncpa [#allocation10], 0 }
   0x5   :  { %19 = vsyncpa [#allocation6], 0 }
   0x6   :  { %21 = vsyncpa [#allocation6 + $0x1], 0  ;;  %s2797_s17 = smov 0   ;;  %s2799_s18 = smov 0  }
   0x7   :  { %s2801_s19 = smov 0   ;;  %s2803_s20 = smov 0  }
   0x8 LB: > { %3510 = sst [smem:[#allocation17_spill]] %s2696_s17  ;;  %s2818_s21 = sadd.s32 4294967295, %s2708_s20   ;;  %s2708_s20 = sphi %s2803_s20, %s3550_s20   ;;  %s2704_s19 = sphi %s2801_s19, %s3552_s19   ;;  %s2700_s18 = sphi %s2799_s18, %s3554_s18   ;;  %s2696_s17 = sphi %s2797_s17, %s3553_s17  }
   0x9   : > { %3511 = sst [smem:[#allocation18_spill]] %s2704_s19  ;;  %s2115_s22 = sadd.s32 4294967294, %s2708_s20  }
   0xa   : > { %3512 = sst [smem:[#allocation19_spill]] %s2708_s20  ;;  %s2822_s23 = sadd.s32 1, %s2708_s20  }
   0xb   : > { %3513 = sst [smem:[#allocation20_spill]] %s2822_s23  ;;  %s280_s24 = sadd.s32 1, %s2704_s19 }
   0xc   : > { %s277_s25 = ssub.s32 %s2708_s20, %s2822_s23  ;;  %p290_p0 = scmp.ne.s32.totalorder %s2704_s19, %s2700_s18 }
   0xd   : > { %p278_p1 = scmp.eq.s32.totalorder %s277_s25, 0  ;;  %p291_p2 = scmp.eq.s32.totalorder %s2818_s21, 1 }
   0xe   : > { %p296_p3 = scmp.ne.s32.totalorder %s2700_s18, %s2696_s17  ;;  %p297_p4 = scmp.eq.s32.totalorder %s2115_s22, 1 }
   0xf   : > { %s2833_s26 = scalar_select %p278_p1, %s2704_s19, %s280_s24  }
  0x10   : > { %p2835_p5 = por %p291_p2, %p290_p0  ;;  %p2839_p6 = por %p297_p4, %p296_p3 }
  0x11   : > { %3514 = sst [smem:[#allocation21_spill]] %s2833_s26  ;;  %p2116_p7 = scmp.ge.s32.totalorder %s2708_s20, 1 }
  0x12   : > { %s3515_s27 = scalar_select %p2835_p5, 1, 0 }
  0x13   : > { %s3516_s28 = scalar_select %p2839_p6, 1, 0 }
  0x14   : > { %p304_p8 = scmp.lt.s32.totalorder %s2708_s20, 3  ;;  %p3500_p9 = scmp.eq.s32.totalorder %s2818_s21, 0 }
  0x15   : > { %3517 = sst [smem:[#allocation22_spill]] %s3516_s28  ;;  %s2710_s30 = smov [#allocation9]  }
  0x16   : > { %p2846_p10 = pnand %p2116_p7, %p304_p8  ;;  %s341_s12 = sshll.u32 %s2710_s30, 4  ;;  %s342_s12 = int_to_ptr.vmem [resolvable:$true] %s341_s12 }
  0x17   : > { %s2711_s14 = smov [#allocation8]   ;;  %s2537_s24 = scalar_lea.hbm %s3493_s6, 128 }
  0x18   : > { %s3518_s29 = scalar_select %p2846_p10, 1, 0 }
  0x19   : > { %p2337_p11 = pneg %p2846_p10  ;;  %s328_s15 = sshll.u32 %s2711_s14, 4  ;;  %s2858_s15 = int_to_ptr.vmem [resolvable:$true] %s328_s15 }
  0x1a   : > { %p2538_p13 = scmp.ne.s32.totalorder %s3493_s6, %s2537_s24  ;;  %p2544_p3 = scmp.lt.u32.totalorder %s2537_s24, %s3493_s6 }
  0x1b   : > { %p2854_p12 = pnand %p3500_p9, %p2337_p11 }
  0x1d   : > { %p2868_p0 = pneg %p2854_p12 }
  0x1f   : > { %p2540_p1 = pnand %p2868_p0, %p2538_p13 }
  0x21   : > { %p2541_p2 = pneg %p2540_p1 }
  0x23   : > { %p2546_p4 = pnand %p2544_p3, %p2541_p2 }
  0x25   : > { %2549 = shalt.err (!%p2546_p4)
}
  0x26   : > { %s2550_s16 = scalar_lea.vmem %s342_s12, 128  ;;  %p2558_p9 = scmp.lt.s32.totalorder %s342_s12, %s342_s12 }
  0x27   : > { %p2551_p7 = scmp.ne.s32.totalorder %s342_s12, %s2550_s16  ;;  %p2559_p6 = scmp.lt.s32.totalorder %s2550_s16, %s2550_s16 }
  0x29   : > { %p2553_p8 = pnand %p2551_p7, %p2868_p0  ;;  %p2560_p5 = por %p2559_p6, %p2558_p9 }
  0x2b   : > { %p2554_p11 = pneg %p2553_p8 }
  0x2d   : > { %p2561_p10 = pnand %p2560_p5, %p2554_p11 }
  0x2f   : > { %2564 = shalt.err (!%p2561_p10)
}
  0x30   : > { %s2712_s26 = smov 64   ;;  %s2713_s22 = smov 4  }
  0x31   : > { %2346 = dma.hbm_to_vmem [thread:$0]  (!%p2854_p12), %s3493_s6, 128, %s342_s12, [#allocation10], %s2712_s26, %s2712_s26, %s2713_s22  }
  0x32   : > { %s2565_s23 = scalar_lea.hbm %s3487_s0, 16 }
  0x33   : > { %p2566_p5 = scmp.ne.s32.totalorder %s3487_s0, %s2565_s23  ;;  %p2572_p10 = scmp.lt.u32.totalorder %s2565_s23, %s3487_s0 }
  0x35   : > { %p2568_p6 = pnand %p2566_p5, %p2868_p0 }
  0x37   : > { %p2569_p9 = pneg %p2568_p6 }
  0x39   : > { %p2574_p13 = pnand %p2572_p10, %p2569_p9 }
  0x3b   : > { %2577 = shalt.err (!%p2574_p13)
}
  0x3c   : > { %s2714_s11 = smov [#allocation4]   ;;  %s2578_s25 = scalar_lea.hbm %s3492_s5, 128 }
  0x3d   : > { %2340 = dma.hbm_to_smem (!%p2854_p12), %s3487_s0, 16, %s2714_s11, [#allocation7]  }
  0x3e   : > { %p2579_p1 = scmp.ne.s32.totalorder %s3492_s5, %s2578_s25  ;;  %p2585_p4 = scmp.lt.u32.totalorder %s2578_s25, %s3492_s5 }
  0x40   : > { %p2581_p2 = pnand %p2579_p1, %p2868_p0 }
  0x42   : > { %p2582_p3 = pneg %p2581_p2 }
  0x44   : > { %p2587_p7 = pnand %p2585_p4, %p2582_p3 }
  0x46   : > { %2590 = shalt.err (!%p2587_p7)
}
  0x47   : > { %s2591_s11 = scalar_lea.vmem %s2858_s15, 128  ;;  %p2599_p6 = scmp.lt.s32.totalorder %s2858_s15, %s2858_s15 }
  0x48   : > { %p2592_p8 = scmp.ne.s32.totalorder %s2858_s15, %s2591_s11  ;;  %p2600_p9 = scmp.lt.s32.totalorder %s2591_s11, %s2591_s11 }
  0x4a   : > { %p2594_p11 = pnand %p2592_p8, %p2868_p0  ;;  %p2601_p10 = por %p2600_p9, %p2599_p6 }
  0x4c   : > { %p2595_p5 = pneg %p2594_p11 }
  0x4e   : > { %p2602_p13 = pnand %p2601_p10, %p2595_p5 }
  0x50   : > { %2605 = shalt.err (!%p2602_p13)
}
  0x51   : > { %2343 = dma.hbm_to_vmem [thread:$0]  (!%p2854_p12), %s3492_s5, 128, %s2858_s15, [#allocation5], %s2712_s26, %s2712_s26, %s2713_s22  }
  0x52   : > { %s2715_s19 = smov [#allocation11]   ;;  %s2606_s14 = scalar_lea.hbm %s3496_s9, 4096 }
  0x53   : > { %s360_s24 = sshll.u32 %s2715_s19, 4  ;;  %p2607_p1 = scmp.ne.s32.totalorder %s3496_s9, %s2606_s14  ;;  %s361_s24 = int_to_ptr.vmem [resolvable:$true] %s360_s24 }
  0x54   : > { %p2613_p4 = scmp.lt.u32.totalorder %s2606_s14, %s3496_s9 }
  0x55   : > { %p2609_p2 = pnand %p2607_p1, %p2868_p0 }
  0x57   : > { %p2610_p3 = pneg %p2609_p2 }
  0x59   : > { %p2615_p7 = pnand %p2613_p4, %p2610_p3 }
  0x5b   : > { %2618 = shalt.err (!%p2615_p7)
}
  0x5c   : > { %s2619_s15 = scalar_lea.vmem %s361_s24, 4096  ;;  %p2627_p6 = scmp.lt.s32.totalorder %s361_s24, %s361_s24 }
  0x5d   : > { %p2620_p8 = scmp.ne.s32.totalorder %s361_s24, %s2619_s15  ;;  %p2628_p9 = scmp.lt.s32.totalorder %s2619_s15, %s2619_s15 }
  0x5f   : > { %p2622_p11 = pnand %p2620_p8, %p2868_p0  ;;  %p2629_p10 = por %p2628_p9, %p2627_p6 }
  0x61   : > { %p2623_p5 = pneg %p2622_p11 }
  0x63   : > { %p2630_p13 = pnand %p2629_p10, %p2623_p5 }
  0x65   : > { %2633 = shalt.err (!%p2630_p13)
}
  0x66   : > { %2349 = dma.hbm_to_vmem [thread:$0]  (!%p2854_p12), %s3496_s9, 4096, %s361_s24, [#allocation10], %s2712_s26, %s2712_s26, %s2713_s22  }
  0x67   : > { %p3521_p1 = scmp.ne.s32.totalorder %s3518_s29, 0 }
  0x68   : > { %p3522_p0 = scmp.eq.s32.totalorder (!%p3521_p1), %s2818_s21, 0 }
  0x69   : > { %403 = sbr.rel (%p3521_p1) target bundleno = 2141 (0x85d), region = 64 }
  0x70   : > { %2679 = dma.done.wait (%p3522_p0), [#allocation7], 16   ;;  %p3523_p2 = pmov %p3522_p0 }
  0x71   : > { %p3524_p3 = pmov %p3522_p0 }
  0x72   : > { %2681 = vsyncadd (%p3523_p2), [#allocation7], 4294967280 }
  0x73   : > { %2683 = dma.done.wait (%p3524_p3), [#allocation5], 128   ;;  %p3525_p4 = pmov %p3522_p0 }
  0x74   : > { %p3526_p7 = pmov %p3522_p0 }
  0x75   : > { %2685 = vsyncadd (%p3525_p4), [#allocation5], 4294967168 }
  0x76   : > { %2687 = dma.done.wait (%p3526_p7), [#allocation10], 4224   ;;  %p3527_p12 = pmov %p3522_p0 }
  0x78   : > { %2689 = vsyncadd (%p3527_p12), [#allocation10], 4294963072 }
  0x79   : > { %421 = sfence }
  0x7a   : > { %p466_p8 = scmp.lt.s32.totalorder %s2818_s21, 1  ;;  %v2716_v0 = vmov 0   ;;  %v495_v1 = vld [vmem:[%s3494_s7] sm:$0xff]  ;;  %v496_v2 = vld [vmem:[%s3494_s7 + $0x8] sm:$0xff]  ;;  %vm516_vm0 = vcmask 1043456   ;;  %vm512_vm1 = vcmask 64512  }
  0x7b   : > { %561 = vmatprep.mubr.bf16.mxu0 %v2716_v0  ;;  %484 = vst [vmem:[#allocation2 + $0x28] sm:$0xff] %v2716_v0  ;;  %2421 = vset.pattern.permute.xlu0 %v2716_v0  ;;  %v2423_v8 = vld [vmem:[%s3491_s4] sm:$0xff]   ;;  %v2717_v14 = vmov 0.0   ;;  %vm2718_vm2 = vmmov 0   ;;  %v2424_v18 = vld [vmem:[#allocation8] sm:$0xff]   ;;  %vm694_vm3 = vcmask 130048  }
  0x7c   : > { %s2975_s22 = scalar_select %p466_p8, %s2818_s21, 1  ;;  %499 = vperm.xlu0 %2421, %v495_v1   ;;  %2422 = vset.pattern.permute.xlu1 %v2716_v0  ;;  %vm779_vm4 = vcmask 261120   ;;  %vm866_vm5 = vcmask 1039360  }
  0x7d   : > { %s463_s23 = sand.u32 1, %s2700_s18   ;;  %s2719_s13 = smov 127  }
  0x7e   : > { %s2222_s19 = sshll.u32 %s2975_s22, 5  ;;  %s2223_s17 = sshll.u32 %s2975_s22, 4 }
  0x7f   : > { %s470_s25 = scalar_lea.vmem %s3488_s1, %s2222_s19  ;;  %s475_s15 = scalar_lea.vmem %s3489_s2, %s2223_s17 }
  0x80   : > { %v486_v3 = vld [vmem:[%s470_s25 + $0x8] sm:$0xff]  ;;  %v485_v4 = vld [vmem:[%s470_s25] sm:$0xff]  ;;  %v488_v5 = vld [vmem:[%s470_s25 + $0x18] sm:$0xff]  ;;  %504 = vperm.xlu0 %2421, %v496_v2   ;;  %s2317_s12 = smul.u32 96, %s463_s23  ;;  %s480_s24 = scalar_lea.vmem %s3490_s3, %s2222_s19 }
  0x81   : > { %v490_v6 = vpack.c.bf16 %v486_v3, %v486_v3  ;;  %v489_v7 = vpack.c.bf16 %v485_v4, %v485_v4  ;;  %v492_v9 = vpack.c.bf16 %v488_v5, %v488_v5  ;;  %v487_v10 = vld [vmem:[%s470_s25 + $0x10] sm:$0xff]  ;;  %v671_v15 = vld [vmem:[%s475_s15] sm:$0xff]  ;;  %v672_v16 = vld [vmem:[%s475_s15 + $0x8] sm:$0xff]  ;;  %s2720_s22 = smov 112   ;;  %s2721_s16 = smov 119  }
  0x82   : > { %v491_v11 = vpack.c.bf16 %v487_v10, %v487_v10  ;;  %v673_v17 = vpack.c.bf16 %v672_v16, %v671_v15  ;;  %s3004_s29 = scalar_lea.vmem [#allocation12], %s2317_s12  ;;  %s2722_s17 = smov 120  }
  0x83   : > { %2134 = vmatprep.subr.msk.bf16.mxu0 %vm516_vm0, %v490_v6  ;;  %v518_v12 = vsel %vm516_vm0, %v489_v7, 0  ;;  %s2723_s20 = smov 121   ;;  %s2724_s11 = smov 1  }
  0x84   : > { %530 = vmatpush1.bf16.msra.mxu0 %v518_v12  ;;  %v524_v13 = vsel %vm516_vm0, %v491_v11, 0  ;;  %s2725_s15 = smov 7   ;;  %s2726_s12 = smov 8  }
  0x85   : > { %2136 = vmatprep.subr.msk.bf16.mxu0 %vm516_vm0, %v492_v9  ;;  %s2727_s30 = smov 9   ;;  %s2190_s26 = sld [smem:[#allocation4 + $0x6]] }
  0x86   : > { %p3545_p5 = scmp.ne.s32.totalorder %s3515_s27, 0 }
  0x87   : > { %2135 = vmatmul.mubr.msk.bf16.vlgmr.msra.gmra.mrb[0].mxu0 %vm512_vm1, %v2423_v8 }
  0x88   : > { %573 = vmatpush1.bf16.msra.mxu0 %v524_v13  ;;  %604 = vmatprep.mubr.bf16.mxu0 %v2716_v0 }
  0x89   : > { %2283 = vmatprep.subr.bf16.mxu0 %v2717_v14 }
  0x8f   : > { %2137 = vmatmul.mubr.msk.bf16.vlgmr.msra.gmra.mrb[4].mxu0 %vm512_vm1, %v2423_v8 }
  0x90   : > { %2285 = vmatprep.mubr.msk.bf16.mxu0 %vm2718_vm2, %v2717_v14  ;;  %2284 = vmatpush3.bf16.msra.mxu0 %v673_v17 }
  0x91   : > { %2289 = vmatprep.subr.bf16.mxu0 %v2717_v14 }
  0x97   : > { %2286 = vmatmul.mubr.msk.bf16.vlgmr.msra.gmra.mrb[8].mxu0 %vm694_vm3, %v2424_v18 }
  0x98   : > { %2293 = vmatprep.mubr.msk.bf16.mxu0 %vm2718_vm2, %v2717_v14 }
  0xfb   : > { %v500_v19 = vpop.permute.xlu0 %499 }
  0xff   : > { %v505_v21 = vpop.permute.xlu0 %504 }
 0x15a   : > { %v563_v20 = vpop.f32.mrb[0].mxu0 }
 0x15b   : > { %v564_v22 = vadd.f32 %v563_v20, %v500_v19  ;;  %v565_v23 = vpop.f32.mrb[1].mxu0  ;;  %v754_v20 = vld [vmem:[%s480_s24 + $0x8] sm:$0xff] }
 0x15c   : > { %v566_v24 = vadd.f32 %v565_v23, %v500_v19  ;;  %v567_v25 = vpop.f32.mrb[2].mxu0  ;;  %v756_v23 = vld [vmem:[%s480_s24 + $0x18] sm:$0xff] }
 0x15d   : > { %v2138_v26 = vmul.f32 -1.442695, %v564_v22  ;;  %v568_v27 = vadd.f32 %v567_v25, %v505_v21  ;;  %v569_v28 = vpop.f32.mrb[3].mxu0 }
 0x15e   : > { %v2139_v29 = vmul.f32 -1.442695, %v566_v24  ;;  %v570_v30 = vadd.f32 %v569_v28, %v505_v21  ;;  %v2430_v28 = vld [vmem:[#allocation11 + $0xc8] sm:$0xff]  }
 0x15f   : > { %2472 = vpow2.f32 %v2138_v26  ;;  %v2142_v31 = vmul.f32 -1.442695, %v568_v27  ;;  %v2427_v26 = vld [vmem:[#allocation11 + $0x80] sm:$0xff]  }
 0x160   : > { %2474 = vpow2.f32 %v2139_v29  ;;  %v2143_v32 = vmul.f32 -1.442695, %v570_v30  ;;  %v2431_v29 = vld [vmem:[#allocation11 + $0x88] sm:$0xff]  }
 0x161   : > { %2476 = vpow2.f32 %v2142_v31  ;;  %v2434_v31 = vld [vmem:[#allocation11 + $0xd0] sm:$0xff]  }
 0x162   : > { %2478 = vpow2.f32 %v2143_v32  ;;  %v606_v33 = vpop.f32.mrb[4].mxu0  ;;  %v2429_v32 = vld [vmem:[#allocation11] sm:$0xff]  }
 0x163   : > { %v607_v34 = vadd.f32 %v606_v33, %v500_v19  ;;  %v608_v35 = vpop.f32.mrb[5].mxu0  ;;  %v2432_v33 = vld [vmem:[#allocation11 + $0x48] sm:$0xff]  }
 0x164   : > { %v609_v36 = vadd.f32 %v608_v35, %v500_v19  ;;  %v610_v37 = vpop.f32.mrb[6].mxu0  ;;  %v753_v19 = vld [vmem:[%s480_s24] sm:$0xff]  ;;  %v2438_v35 = vld [vmem:[#allocation11 + $0xd8] sm:$0xff]  }
 0x165   : > { %v2140_v38 = vmul.f32 -1.442695, %v607_v34  ;;  %v611_v39 = vadd.f32 %v610_v37, %v505_v21  ;;  %v612_v40 = vpop.f32.mrb[7].mxu0  ;;  %v2436_v37 = vld [vmem:[#allocation11 + $0x50] sm:$0xff]  }
 0x166   : > { %v2141_v41 = vmul.f32 -1.442695, %v609_v36  ;;  %v613_v42 = vadd.f32 %v612_v40, %v505_v21  ;;  %v757_v21 = vpack.c.bf16 %v754_v20, %v753_v19  ;;  %v2437_v40 = vld [vmem:[#allocation11 + $0x10] sm:$0xff]  }
 0x167   : > { %2480 = vpow2.f32 %v2140_v38  ;;  %v2144_v43 = vmul.f32 -1.442695, %v611_v39  ;;  %v2439_v38 = vld [vmem:[#allocation11 + $0x98] sm:$0xff]  }
 0x168   : > { %2482 = vpow2.f32 %v2141_v41  ;;  %v2145_v44 = vmul.f32 -1.442695, %v613_v42  ;;  %2290 = vmatpush3.bf16.msra.mxu0 %v757_v21  ;;  %v2440_v41 = vld [vmem:[#allocation11 + $0x58] sm:$0xff]  }
 0x169   : > { %v2473_v45 = vpop.eup %2472  ;;  %2484 = vpow2.f32 %v2144_v43  ;;  %2291 = vmatprep.subr.bf16.mxu0 %v2717_v14  ;;  %v2446_v43 = vld [vmem:[#allocation11 + $0xe8] sm:$0xff]  }
 0x16a   : > { %v2475_v46 = vpop.eup %2474  ;;  %v639_v47 = vadd.f32 1.0, %v2473_v45  ;;  %2486 = vpow2.f32 %v2145_v44  ;;  %v2441_v44 = vld [vmem:[#allocation11 + $0x18] sm:$0xff]   ;;  %v2444_v45 = vld [vmem:[#allocation11 + $0x60] sm:$0xff]  }
 0x16b   : > { %v2477_v48 = vpop.eup %2476  ;;  %v640_v49 = vadd.f32 1.0, %v2475_v46  ;;  %v2447_v46 = vld [vmem:[#allocation11 + $0xa8] sm:$0xff]  }
 0x16c   : > { %v2479_v50 = vpop.eup %2478  ;;  %2488 = vrcp.f32 %v639_v47  ;;  %v643_v51 = vadd.f32 1.0, %v2477_v48  ;;  %v2445_v47 = vld [vmem:[#allocation11 + $0x20] sm:$0xff]   ;;  %v2448_v48 = vld [vmem:[#allocation11 + $0x68] sm:$0xff]  }
 0x16d   : > { %2490 = vrcp.f32 %v640_v49  ;;  %v644_v52 = vadd.f32 1.0, %v2479_v50  ;;  %v1271_v49 = vlaneseq }
 0x16e   : > { %2492 = vrcp.f32 %v643_v51  ;;  %v2449_v51 = vld [vmem:[#allocation11 + $0x28] sm:$0xff]  }
 0x16f   : > { %2494 = vrcp.f32 %v644_v52  ;;  %v3039_v50 = vand.u32 127, %v1271_v49  ;;  %v2450_v52 = vld [vmem:[#allocation11 + $0xf0] sm:$0xff]   ;;  %v1284_v19 = vshrl.u32 %v1271_v49, 7 }
 0x171   : > { %v2481_v53 = vpop.eup %2480 }
 0x172   : > { %v2483_v54 = vpop.eup %2482  ;;  %v641_v55 = vadd.f32 1.0, %v2481_v53  ;;  %v2451_v53 = vld [vmem:[#allocation11 + $0xb0] sm:$0xff]  }
 0x173   : > { %v2485_v56 = vpop.eup %2484  ;;  %v642_v57 = vadd.f32 1.0, %v2483_v54  ;;  %v2452_v54 = vld [vmem:[#allocation11 + $0x70] sm:$0xff]  }
 0x174   : > { %v2487_v58 = vpop.eup %2486  ;;  %2496 = vrcp.f32 %v641_v55  ;;  %v645_v59 = vadd.f32 1.0, %v2485_v56  ;;  %v1274_v55 = vshra.s32 %v3039_v50, 3  ;;  %v2453_v56 = vld [vmem:[#allocation11 + $0x30] sm:$0xff]  }
 0x175   : > { %2498 = vrcp.f32 %v642_v57  ;;  %v646_v60 = vadd.f32 1.0, %v2487_v58  ;;  %v2454_v57 = vld [vmem:[#allocation11 + $0xf8] sm:$0xff]  }
 0x176   : > { %v2489_v61 = vpop.eup %2488  ;;  %2500 = vrcp.f32 %v645_v59  ;;  %v2455_v58 = vld [vmem:[#allocation11 + $0xb8] sm:$0xff]  }
 0x177   : > { %v2491_v62 = vpop.eup %2490  ;;  %v663_v63 = vmul.f32 %v2489_v61, %v564_v22  ;;  %2502 = vrcp.f32 %v646_v60  ;;  %v755_v22 = vld [vmem:[%s480_s24 + $0x10] sm:$0xff]  ;;  %v2456_v60 = vld [vmem:[#allocation11 + $0x78] sm:$0xff]   ;;  %v1273_v61 = vand.u32 7, %v3039_v50  ;;  %s2191_s24 = sld [smem:[#allocation4 + $0x7]] }
 0x178   : > { %v2493_v1 = vpop.eup %2492  ;;  %v664_v2 = vmul.f32 %v2491_v62, %v566_v24  ;;  %v2425_v24 = vld [vmem:[#allocation11 + $0xc0] sm:$0xff]   ;;  %v758_v25 = vpack.c.bf16 %v756_v23, %v755_v22  ;;  %v1275_v62 = vand.u32 7, %v1274_v55 }
 0x179   : > { %v2495_v3 = vpop.eup %2494  ;;  %1960 = vst [vmem:[%s3004_s29] sm:$0xff] %v663_v63  ;;  %v667_v4 = vmul.f32 %v2493_v1, %v568_v27  ;;  %2252 = vmatprep.subr.bf16.mxu1 %v2425_v24  ;;  %v2428_v27 = vld [vmem:[#allocation11 + $0x40] sm:$0xff]   ;;  %vm3046_vm6 = vcmp.eq.s32.totalorder %v1273_v61, 0  ;;  %vm3069_vm9 = vcmp.eq.s32.totalorder %v1273_v61, 7 }
 0x17a   : > { %1961 = vst [vmem:[%s3004_s29 + $0x8] sm:$0xff] %v664_v2  ;;  %v668_v5 = vmul.f32 %v2495_v3, %v570_v30  ;;  %2253 = vmatpush3.bf16.msra.mxu1 %v2427_v26  ;;  %v2426_v30 = vld [vmem:[#allocation9] sm:$0xff]   ;;  %2292 = vmatpush3.bf16.msra.mxu0 %v758_v25  ;;  %vm1278_vm7 = vcmp.eq.s32.totalorder %v1275_v62, 0  ;;  %v2146_v25 = vld [vmem:[%s3494_s7 + $0x10] sm:$0xff]  ;;  %vm1279_vm14 = vcmp.eq.s32.totalorder %v1275_v62, 7  ;;  %vm1351_vm15 = vmpackc.low %vm3046_vm6, %vm3046_vm6 }
 0x17b   : > { %v3008_v6 = vpack.c.bf16 %v667_v4, %v663_v63  ;;  %1964 = vst [vmem:[%s3004_s29 + $0x30] sm:$0xff] %v667_v4  ;;  %2254 = vmatprep.subr.bf16.mxu1 %v2430_v28  ;;  %2230 = vmatprep.subr.bf16.mxu0 %v2428_v27  ;;  %v2457_v63 = vld [vmem:[#allocation11 + $0x38] sm:$0xff]   ;;  %vm3063_vm8 = vmor %vm1278_vm7, %vm3046_vm6 }
 0x17c   : > { %v3011_v7 = vpack.c.bf16 %v668_v5, %v664_v2  ;;  %1965 = vst [vmem:[%s3004_s29 + $0x38] sm:$0xff] %v668_v5  ;;  %vm1281_vm10 = vmpackc.low %vm3063_vm8, %vm3063_vm8 }
 0x17d   : > { %2294 = vmatmul.mubr.msk.bf16.vlgmr.msra.gmra.mrb[12].mxu0 %vm779_vm4, %v2426_v30  ;;  %vm3085_vm11 = vmor %vm1278_vm7, %vm3069_vm9  ;;  %v1282_v26 = vsel %vm1281_vm10, 65537, %v2716_v0 }
 0x17e   : > { %v2497_v8 = vpop.eup %2496  ;;  %858 = vrot.lane.b32.xlu1 %v3011_v7, %s2719_s13  ;;  %2255 = vmatpush3.bf16.msra.mxu1 %v2431_v29  ;;  %vm1304_vm12 = vmpackc.low %vm1278_vm7, %vm1278_vm7 }
 0x17f   : > { %v2499_v9 = vpop.eup %2498  ;;  %v665_v10 = vmul.f32 %v2497_v8, %v607_v34  ;;  %v2435_v34 = vld [vmem:[#allocation11 + $0x90] sm:$0xff]   ;;  %2256 = vmatprep.subr.bf16.mxu1 %v2434_v31  ;;  %2231 = vmatpush3.bf16.msra.mxu0 %v2429_v32  ;;  %vm1328_vm13 = vmpackc.low %vm3085_vm11, %vm3085_vm11  ;;  %v1305_v28 = vsel %vm1304_vm12, 65537, %v2716_v0  ;;  %vm900_vm11 = vcmask 916480  }
 0x180   : > { %v2501_v11 = vpop.eup %2500  ;;  %v666_v12 = vmul.f32 %v2499_v9, %v609_v36  ;;  %v2433_v36 = vld [vmem:[#allocation11 + $0x8] sm:$0xff]   ;;  %2232 = vmatprep.subr.bf16.mxu0 %v2432_v33  ;;  %v3054_v9 = vpop.f32.mrb[8].mxu0  ;;  %v1329_v29 = vsel %vm1328_vm13, 65537, %v2716_v0  ;;  %vm3116_vm0 = vmor %vm1279_vm14, %vm3046_vm6  ;;  %v1352_v33 = vsel %vm1351_vm15, 65537, %v2716_v0 }
 0x181   : > { %v2503_v13 = vpop.eup %2502  ;;  %1962 = vst [vmem:[%s3004_s29 + $0x10] sm:$0xff] %v665_v10  ;;  %v669_v15 = vmul.f32 %v2501_v11, %v611_v39  ;;  %v2442_v39 = vld [vmem:[#allocation11 + $0xe0] sm:$0xff]   ;;  %v2287_v11 = vpop.f32.mrb[9].mxu0  ;;  %vm1376_vm7 = vmpackc.low %vm3069_vm9, %vm3069_vm9 }
 0x182   : > { %1963 = vst [vmem:[%s3004_s29 + $0x18] sm:$0xff] %v666_v12  ;;  %v670_v16 = vmul.f32 %v2503_v13, %v613_v42  ;;  %2257 = vmatpush3.bf16.msra.mxu1 %v2435_v34  ;;  %v2443_v42 = vld [vmem:[#allocation11 + $0xa0] sm:$0xff]   ;;  %vm1399_vm6 = vmpackc.low %vm3116_vm0, %vm3116_vm0  ;;  %v1377_v34 = vsel %vm1376_vm7, 65537, %v2716_v0 }
 0x183   : > { %v3018_v17 = vpack.c.bf16 %v669_v15, %v665_v10  ;;  %1966 = vst [vmem:[%s3004_s29 + $0x40] sm:$0xff] %v669_v15  ;;  %2258 = vmatprep.subr.bf16.mxu1 %v2438_v35  ;;  %2233 = vmatpush3.bf16.msra.mxu0 %v2433_v36  ;;  %vm1422_vm8 = vmpackc.low %vm1279_vm14, %vm1279_vm14  ;;  %v1252_v35 = vstv %s2190_s26  ;;  %s2209_s26 = sld [smem:[#allocation4 + $0x5]] }
 0x184   : > { %v3021_v18 = vpack.c.bf16 %v670_v16, %v666_v12  ;;  %1967 = vst [vmem:[%s3004_s29 + $0x48] sm:$0xff] %v670_v16  ;;  %2234 = vmatprep.subr.bf16.mxu0 %v2436_v37  ;;  %vm3136_vm10 = vmor %vm1279_vm14, %vm3069_vm9 }
 0x185   : > { %860 = vrot.lane.b32.xlu1 %v3018_v17, %s2719_s13  ;;  %vm1446_vm9 = vmpackc.low %vm3136_vm10, %vm3136_vm10  ;;  %vm1345_vm10 = vcmask 56320  }
 0x186   : > { %862 = vrot.lane.b32.xlu0 %v3021_v18, %s2719_s13  ;;  %2259 = vmatpush3.bf16.msra.mxu1 %v2439_v38  ;;  %v1400_v38 = vsel %vm1399_vm6, 65537, %v2716_v0 }
 0x187   : > { %2260 = vmatprep.subr.bf16.mxu1 %v2442_v39  ;;  %2235 = vmatpush3.bf16.msra.mxu0 %v2437_v40  ;;  %v1423_v39 = vsel %vm1422_vm8, 65537, %v2716_v0  ;;  %vm1298_vm8 = vcmask 72704  }
 0x188   : > { %2236 = vmatprep.subr.bf16.mxu0 %v2440_v41 }
 0x189   : > { %864 = vrot.lane.b32.xlu1 %v2716_v0, %s2719_s13 }
 0x18a   : > { %856 = vrot.lane.b32.xlu0 %v3008_v6, %s2719_s13  ;;  %2261 = vmatpush3.bf16.msra.mxu1 %v2443_v42  ;;  %v1447_v42 = vsel %vm1446_vm9, 65537, %v2716_v0  ;;  %vm1368_vm9 = vcmask 7168  }
 0x18b   : > { %2262 = vmatprep.subr.bf16.mxu1 %v2446_v43  ;;  %2237 = vmatpush3.bf16.msra.mxu0 %v2441_v44  ;;  %v735_v44 = vpop.f32.mrb[10].mxu0 }
 0x18c   : > { %2238 = vmatprep.subr.bf16.mxu0 %v2444_v45  ;;  %v2288_v45 = vpop.f32.mrb[11].mxu0 }
 0x18e   : > { %2263 = vmatpush3.bf16.msra.mxu1 %v2447_v46 }
 0x18f   : > { %2239 = vmatpush3.bf16.msra.mxu0 %v2445_v47  ;;  %2264 = vmatprep.subr.bf16.mxu1 %v2450_v52 }
 0x190   : > { %2240 = vmatprep.subr.bf16.mxu0 %v2448_v48 }
 0x192   : > { %2265 = vmatpush3.bf16.msra.mxu1 %v2451_v53 }
 0x193   : > { %2241 = vmatpush3.bf16.msra.mxu0 %v2449_v51  ;;  %2266 = vmatprep.subr.bf16.mxu1 %v2454_v57 }
 0x194   : > { %2242 = vmatprep.subr.bf16.mxu0 %v2452_v54 }
 0x196   : > { %2267 = vmatpush3.bf16.msra.mxu1 %v2455_v58 }
 0x197   : > { %2243 = vmatpush3.bf16.msra.mxu0 %v2453_v56  ;;  %2297 = vmatprep.subr.bf16.mxu1 %v2717_v14 }
 0x198   : > { %2244 = vmatprep.subr.bf16.mxu0 %v2456_v60 }
 0x19b   : > { %2245 = vmatpush3.bf16.msra.mxu0 %v2457_v63 }
 0x19c   : > { %1503 = vmatprep.subr.bf16.mxu0 %v2716_v0 }
 0x1f0   : > { %v859_v59 = vpop.permute.xlu1 %858 }
 0x1f7   : > { %v861_v1 = vpop.permute.xlu1 %860 }
 0x1f8   : > { %v868_v2 = vsel %vm866_vm5, %v859_v59, %v861_v1  ;;  %v863_v3 = vpop.permute.xlu0 %862 }
 0x1f9   : > { %v3051_v5 = vmax.bf16 %v868_v2, %v3011_v7  ;;  %v869_v8 = vsel %vm866_vm5, %v861_v1, %v863_v3 }
 0x1fa   : > { %v3057_v10 = vmax.bf16 %v869_v8, %v3018_v17 }
 0x1fb   : > { %892 = vrot.lane.b32.xlu1 %v3051_v5, %s2720_s22  ;;  %v865_v12 = vpop.permute.xlu1 %864 }
 0x1fc   : > { %v870_v15 = vsel %vm866_vm5, %v863_v3, %v865_v12  ;;  %894 = vrot.lane.b32.xlu0 %v3057_v10, %s2720_s22  ;;  %v857_v16 = vpop.permute.xlu0 %856  ;;  %v884_v21 = vmax.bf16 %v2716_v0, %v865_v12  ;;  %v3169_v3 = vld [vmem:[#allocation2] sm:$0xff] }
 0x1fd   : > { %v3074_v20 = vmax.bf16 %v870_v15, %v3021_v18  ;;  %v867_v22 = vsel %vm866_vm5, %v857_v16, %v859_v59  ;;  %v3089_v18 = vsub.s32 0, %v1284_v19 }
 0x1fe   : > { %v3092_v24 = vmax.bf16 %v867_v22, %v3008_v6  ;;  %v2147_v6 = vld [vmem:[%s3494_s7 + $0x18] sm:$0xff] }
 0x1ff   : > { %896 = vrot.lane.b32.xlu1 %v3074_v20, %s2720_s22  ;;  %v1286_v27 = vrot.slane %v1282_v26, %v3089_v18  ;;  %v1309_v31 = vrot.slane %v1305_v28, %v3089_v18  ;;  %v1333_v32 = vrot.slane %v1329_v29, %v3089_v18  ;;  %v1356_v36 = vrot.slane %v1352_v33, %v3089_v18 }
 0x200   : > { %898 = vrot.lane.b32.xlu0 %v884_v21, %s2720_s22  ;;  %v1381_v37 = vrot.slane %v1377_v34, %v3089_v18  ;;  %v1404_v40 = vrot.slane %v1400_v38, %v3089_v18  ;;  %v1427_v41 = vrot.slane %v1423_v39, %v3089_v18  ;;  %v1451_v43 = vrot.slane %v1447_v42, %v3089_v18 }
 0x203   : > { %890 = vrot.lane.b32.xlu1 %v3092_v24, %s2720_s22  ;;  %s2192_s22 = sld [smem:[#allocation4 + $0x8]] }
 0x204   : > { %681 = vperm.xlu0 %2421, %v2146_v25  }
 0x207   : > { %686 = vperm.xlu1 %2422, %v2147_v6  }
 0x208   : > { %1287 = vrot.lane.b32.xlu0 %v1286_v27, %s2721_s16 }
 0x20b   : > { %1310 = vrot.lane.b32.xlu1 %v1309_v31, %s2722_s17 }
 0x20c   : > { %1334 = vrot.lane.b32.xlu0 %v1333_v32, %s2723_s20 }
 0x20f   : > { %1357 = vrot.lane.b32.xlu1 %v1356_v36, %s2719_s13  ;;  %v1256_v36 = vstv %s2191_s24  ;;  %s2208_s24 = sld [smem:[#allocation4 + $0x2]] }
 0x210   : > { %1382 = vrot.lane.b32.xlu0 %v1381_v37, %s2724_s11 }
 0x213   : > { %1405 = vrot.lane.b32.xlu1 %v1404_v40, %s2725_s15 }
 0x214   : > { %1428 = vrot.lane.b32.xlu0 %v1427_v41, %s2726_s12  ;;  %v1262_v41 = vstv %s2192_s22  ;;  %s2734_s22 = smov [#allocation12]  }
 0x215   : > { %s2638_s19 = sshll.u32 %s2734_s22, 4  ;;  %s2639_s19 = int_to_ptr.vmem [resolvable:$false] %s2638_s19 }
 0x217   : > { %1452 = vrot.lane.b32.xlu1 %v1451_v43, %s2727_s30 }
 0x250   : > { %v3160_v55 = vpop.f32.mrb[12].mxu0 }
 0x251   : > { %v2295_v58 = vpop.f32.mrb[13].mxu0 }
 0x252   : > { %v3163_v60 = vpop.f32.mrb[14].mxu0 }
 0x253   : > { %v2296_v62 = vpop.f32.mrb[15].mxu0 }
 0x26d   : > { %v893_v46 = vpop.permute.xlu1 %892 }
 0x26e   : > { %v895_v47 = vpop.permute.xlu0 %894 }
 0x26f   : > { %v902_v48 = vsel %vm900_vm11, %v893_v46, %v895_v47 }
 0x270   : > { %v910_v49 = vmax.bf16 %v902_v48, %v3051_v5 }
 0x271   : > { %v897_v0 = vpop.permute.xlu1 %896 }
 0x272   : > { %v903_v51 = vsel %vm900_vm11, %v895_v47, %v897_v0  ;;  %1201 = vmatprep.mubr.bf16.mxu0 %v910_v49  ;;  %v899_v52 = vpop.permute.xlu0 %898 }
 0x273   : > { %v904_v53 = vsel %vm900_vm11, %v897_v0, %v899_v52  ;;  %v911_v56 = vmax.bf16 %v903_v51, %v3057_v10 }
 0x274   : > { %v912_v54 = vmax.bf16 %v904_v53, %v3074_v20 }
 0x275   : > { %v891_v57 = vpop.permute.xlu1 %890 }
 0x276   : > { %v901_v59 = vsel %vm900_vm11, %v891_v57, %v893_v46  ;;  %1242 = vmatprep.mubr.bf16.mxu1 %v912_v54  ;;  %vm1439_vm11 = vcmask 982016  }
 0x277   : > { %v909_v61 = vmax.bf16 %v901_v59, %v3092_v24  ;;  %1243 = vmatmul.mubr.bf16.vlgmr.msra.gmra.mrb[0].mxu1 %v911_v56 }
 0x278   : > { %2313 = vmatprep.mubr.msk.bf16.mxu1 %vm2718_vm2, %v2717_v14 }
 0x279   : > { %1202 = vmatmul.mubr.bf16.vlgmr.msra.gmra.mrb[16].mxu0 %v909_v61 }
 0x283   : > { %v682_v63 = vpop.permute.xlu0 %681 }
 0x284   : > { %v733_v1 = vadd.f32 %v3054_v9, %v682_v63 }
 0x286   : > { %v687_v2 = vpop.permute.xlu1 %686  ;;  %v2150_v16 = vmul.f32 -1.442695, %v733_v1 }
 0x287   : > { %v3171_v4 = vpop.permute.xlu0 %1287  ;;  %v736_v5 = vadd.f32 %v735_v44, %v687_v2 }
 0x288   : > { %vm1289_vm12 = vcmp.ne.s16.totalorder %v3171_v4, 0  ;;  %2504 = vpow2.f32 %v2150_v16 }
 0x289   : > { %v1290_v8 = vsel %vm1289_vm12, 0, %v3169_v3  ;;  %v2151_v19 = vmul.f32 -1.442695, %v736_v5 }
 0x28a   : > { %v3177_v10 = vpop.permute.xlu1 %1310  ;;  %1294 = vrot.lane.b32.xlu0 %v1290_v8, %s2727_s30  ;;  %v2193_v8 = vld [vmem:[%s3494_s7 + $0x30] sm:$0xff] }
 0x28b   : > { %vm1312_vm2 = vcmp.ne.s16.totalorder %v3177_v10, 0  ;;  %v3181_v11 = vpop.permute.xlu0 %1334  ;;  %2506 = vpow2.f32 %v2151_v19 }
 0x28c   : > { %v1313_v9 = vsel %vm1312_vm2, 0, %v3169_v3  ;;  %vm1336_vm13 = vcmp.ne.s16.totalorder %v3181_v11, 0 }
 0x28d   : > { %v1337_v12 = vsel %vm1336_vm13, 0, %v3169_v3 }
 0x28e   : > { %1317 = vrot.lane.b32.xlu0 %v1313_v9, %s2726_s12  ;;  %v3191_v13 = vpop.permute.xlu1 %1357  ;;  %v2458_v9 = vld [vmem:[%s3495_s8 + $0x4] ss:$8 sps:$4 sm:$0xff]  }
 0x28f   : > { %vm1359_vm14 = vcmp.ne.s16.totalorder %v3191_v13, 0  ;;  %v1383_v52 = vpop.permute.xlu0 %1382  ;;  %2197 = vmatprep.mubr.msk.bf16.mxu0 %vm694_vm3, %v2458_v9  ;;  %v2467_v9 = vld [vmem:[%s3497_s10 + $0x30] sm:$0xff]  }
 0x290   : > { %v1360_v15 = vsel %vm1359_vm14, 0, %v3169_v3  ;;  %vm1384_vm15 = vcmp.ne.s16.totalorder %v1383_v52, 0 }
 0x291   : > { %v1386_v10 = vsel %vm1384_vm15, 0, %v3011_v7 }
 0x292   : > { %1341 = vrot.lane.b32.xlu0 %v1337_v12, %s2725_s15  ;;  %v2505_v17 = vpop.eup %2504  ;;  %v1406_v56 = vpop.permute.xlu1 %1405 }
 0x293   : > { %v745_v21 = vadd.f32 1.0, %v2505_v17  ;;  %vm1407_vm0 = vcmp.ne.s16.totalorder %v1406_v56, 0  ;;  %v1429_v59 = vpop.permute.xlu0 %1428 }
 0x294   : > { %vm1430_vm7 = vcmp.ne.s16.totalorder %v1429_v59, 0  ;;  %v1409_v11 = vsel %vm1407_vm0, 0, %v3011_v7 }
 0x295   : > { %v2507_v20 = vpop.eup %2506  ;;  %2508 = vrcp.f32 %v745_v21  ;;  %v1432_v12 = vsel %vm1430_vm7, 0, %v3011_v7 }
 0x296   : > { %1364 = vrot.lane.b32.xlu0 %v1360_v15, %s2724_s11  ;;  %v746_v22 = vadd.f32 1.0, %v2507_v20  ;;  %v1453_v63 = vpop.permute.xlu1 %1452  ;;  %v2194_v15 = vld [vmem:[%s3494_s7 + $0x38] sm:$0xff] }
 0x297   : > { %vm1454_vm6 = vcmp.ne.s16.totalorder %v1453_v63, 0 }
 0x298   : > { %2510 = vrcp.f32 %v746_v22  ;;  %v1456_v13 = vsel %vm1454_vm6, 0, %v3011_v7  ;;  %v3252_v22 = vld [vmem:[#allocation2 + $0x28] sm:$0xff] }
 0x29f   : > { %v2509_v24 = vpop.eup %2508 }
 0x2a0   : > { %v751_v31 = vmul.f32 %v2509_v24, %v733_v1 }
 0x2a2   : > { %v2511_v28 = vpop.eup %2510  ;;  %v1253_v42 = vmul.f32 %v1252_v35, %v751_v31  ;;  %v1263_v45 = vmul.f32 %v1262_v41, %v751_v31 }
 0x2a3   : > { %v752_v38 = vmul.f32 %v2511_v28, %v736_v5 }
 0x2a5   : > { %v1254_v46 = vmul.f32 %v1252_v35, %v752_v38  ;;  %v1264_v49 = vmul.f32 %v1262_v41, %v752_v38  ;;  %v2460_v41 = vld [vmem:[%s3495_s8] ss:$8 sps:$4 sm:$0xff]  }
 0x2fc   : > { %v1295_v16 = vpop.permute.xlu0 %1294 }
 0x300   : > { %v1318_v19 = vpop.permute.xlu0 %1317 }
 0x304   : > { %v1342_v17 = vpop.permute.xlu0 %1341 }
 0x34a   : > { %v2268_v23 = vpop.f32.mrb[0].mxu1 }
 0x34b   : > { %v2269_v25 = vpop.f32.mrb[1].mxu1 }
 0x34c   : > { %v2270_v26 = vadd.f32 %v2269_v25, %v2268_v23  ;;  %v2246_v6 = vpop.f32.mrb[16].mxu0  ;;  %v2271_v27 = vpop.f32.mrb[2].mxu1 }
 0x34d   : > { %v2247_v29 = vpop.f32.mrb[17].mxu0  ;;  %v2272_v30 = vpop.f32.mrb[3].mxu1 }
 0x34e   : > { %v2248_v32 = vadd.f32 %v2247_v29, %v2246_v6  ;;  %v2273_v33 = vadd.f32 %v2272_v30, %v2271_v27  ;;  %v2249_v34 = vpop.f32.mrb[18].mxu0  ;;  %v1365_v23 = vpop.permute.xlu0 %1364 }
 0x34f   : > { %v2250_v37 = vpop.f32.mrb[19].mxu0 }
 0x350   : > { %v1245_v39 = vadd.f32 %v2270_v26, %v2248_v32  ;;  %v2251_v40 = vadd.f32 %v2250_v37, %v2249_v34 }
 0x352   : > { %v1257_v43 = vmul.f32 %v1256_v36, %v1245_v39  ;;  %v1248_v44 = vadd.f32 %v2273_v33, %v2251_v40 }
 0x354   : > { %v1259_v47 = vadd.f32 %v1257_v43, %v1253_v42  ;;  %v1258_v48 = vmul.f32 %v1256_v36, %v1248_v44 }
 0x356   : > { %v1265_v0 = vadd.f32 %v1263_v45, %v1259_v47  ;;  %v1260_v51 = vadd.f32 %v1258_v48, %v1254_v46  ;;  %v2153_v45 = vld [vmem:[%s3494_s7 + $0x28] sm:$0xff] }
 0x358   : > { %v1266_v53 = vadd.f32 %v1264_v49, %v1260_v51 }
 0x35a   : > { %v3199_v54 = vpack.c.bf16 %v1266_v53, %v1265_v0 }
 0x35c   : > { %v1291_v57 = vsel %vm1289_vm12, 0, %v3199_v54  ;;  %v1385_v58 = vsel %vm1384_vm15, 0, %v3199_v54  ;;  %1373 = vst [vmem:[#allocation3 + $0x80] sm:$0xff] %v3199_v54  ;;  %v1314_v61 = vsel %vm1312_vm2, 0, %v3199_v54  ;;  %v1408_v62 = vsel %vm1407_vm0, 0, %v3199_v54 }
 0x35d   : > { %1296 = vrot.lane.b32.xlu1 %v1291_v57, %s2727_s30  ;;  %1389 = vrot.lane.b32.xlu0 %v1385_v58, %s2719_s13  ;;  %v1338_v1 = vsel %vm1336_vm13, 0, %v3199_v54  ;;  %v1431_v2 = vsel %vm1430_vm7, 0, %v3199_v54  ;;  %v1361_v4 = vsel %vm1359_vm14, 0, %v3199_v54  ;;  %v1455_v5 = vsel %vm1454_vm6, 0, %v3199_v54  ;;  %s2733_s30 = smov 5  }
 0x35e   : > { %vm1463_vm12 = vcmask 973824  }
 0x361   : > { %1319 = vrot.lane.b32.xlu1 %v1314_v61, %s2726_s12  ;;  %1412 = vrot.lane.b32.xlu0 %v1408_v62, %s2723_s20  ;;  %v2461_v62 = vld [vmem:[%s3497_s10] sm:$0xff]   ;;  %s2730_s12 = smov 125  }
 0x362   : > { %2298 = vmatpush3.bf16.msra.mxu1 %v2461_v62 }
 0x363   : > { %2299 = vmatprep.subr.bf16.mxu1 %v2717_v14 }
 0x365   : > { %1343 = vrot.lane.b32.xlu1 %v1338_v1, %s2725_s15  ;;  %1435 = vrot.lane.b32.xlu0 %v1431_v2, %s2722_s17  ;;  %v2462_v2 = vld [vmem:[%s3497_s10 + $0x8] sm:$0xff]   ;;  %s2729_s15 = smov 124  }
 0x366   : > { %2300 = vmatpush3.bf16.msra.mxu1 %v2462_v2 }
 0x367   : > { %2301 = vmatprep.subr.bf16.mxu1 %v2717_v14 }
 0x369   : > { %1366 = vrot.lane.b32.xlu1 %v1361_v4, %s2724_s11  ;;  %1459 = vrot.lane.b32.xlu0 %v1455_v5, %s2721_s16  ;;  %v2463_v5 = vld [vmem:[%s3497_s10 + $0x10] sm:$0xff]  }
 0x36a   : > { %2302 = vmatpush3.bf16.msra.mxu1 %v2463_v5 }
 0x36b   : > { %2303 = vmatprep.subr.bf16.mxu1 %v2717_v14 }
 0x36d   : > { %1391 = vrot.lane.b32.xlu1 %v1386_v10, %s2719_s13  ;;  %1483 = vperm.xlu0 %2421, %v2193_v8   ;;  %v2464_v8 = vld [vmem:[%s3497_s10 + $0x18] sm:$0xff]   ;;  %v2465_v10 = vld [vmem:[%s3497_s10 + $0x20] sm:$0xff]  }
 0x36e   : > { %2304 = vmatpush3.bf16.msra.mxu1 %v2464_v8 }
 0x36f   : > { %2305 = vmatprep.subr.bf16.mxu1 %v2717_v14 }
 0x371   : > { %1414 = vrot.lane.b32.xlu1 %v1409_v11, %s2723_s20  ;;  %v2466_v11 = vld [vmem:[%s3497_s10 + $0x28] sm:$0xff]   ;;  %s2732_s20 = smov 4  }
 0x372   : > { %2306 = vmatpush3.bf16.msra.mxu1 %v2465_v10 }
 0x373   : > { %2307 = vmatprep.subr.bf16.mxu1 %v2717_v14 }
 0x375   : > { %1437 = vrot.lane.b32.xlu1 %v1432_v12, %s2722_s17  ;;  %v2468_v12 = vld [vmem:[%s3497_s10 + $0x38] sm:$0xff]  }
 0x376   : > { %2308 = vmatpush3.bf16.msra.mxu1 %v2466_v11 }
 0x377   : > { %2309 = vmatprep.subr.bf16.mxu1 %v2717_v14 }
 0x379   : > { %1461 = vrot.lane.b32.xlu1 %v1456_v13, %s2721_s16  ;;  %s2731_s16 = smov 3  }
 0x37a   : > { %2310 = vmatpush3.bf16.msra.mxu1 %v2467_v9 }
 0x37b   : > { %2311 = vmatprep.subr.bf16.mxu1 %v2717_v14  ;;  %v1702_v14 = vand.u32 3, %v3039_v50 }
 0x37d   : > { %1488 = vperm.xlu1 %2422, %v2194_v15   ;;  %vm3317_vm2 = vcmp.eq.s32.totalorder %v1702_v14, 0  ;;  %vm3324_vm13 = vcmp.eq.s32.totalorder %v1702_v14, 3 }
 0x37e   : > { %2312 = vmatpush3.bf16.msra.mxu1 %v2468_v12  ;;  %vm1803_vm15 = vmpackc.low %vm3324_vm13, %vm3324_vm13 }
 0x37f   : > { %1905 = vmatprep.subr.bf16.mxu1 %v3252_v22 }
 0x381   : > { %1566 = vrot.lane.b32.xlu1 %v3011_v7, %s2719_s13 }
 0x3cf   : > { %v1297_v20 = vpop.permute.xlu1 %1296  ;;  %v1390_v27 = vpop.permute.xlu0 %1389 }
 0x3d0   : > { %v1299_v21 = vsel %vm1298_vm8, %v1295_v16, %v1297_v20 }
 0x3d1   : > { %1301 = vst [vmem:[#allocation3] sm:$0xff] %v1299_v21  ;;  %1504 = vmatpush1.bf16.msra.mxu0 %v1299_v21 }
 0x3d2   : > { %1505 = vmatprep.subr.bf16.mxu0 %v3252_v22 }
 0x3d3   : > { %v1320_v24 = vpop.permute.xlu1 %1319  ;;  %v1413_v30 = vpop.permute.xlu0 %1412 }
 0x3d4   : > { %v1322_v25 = vsel %vm512_vm1, %v1318_v19, %v1320_v24  ;;  %vm1416_vm1 = vcmask 990208   ;;  %v2152_v19 = vld [vmem:[%s3494_s7 + $0x20] sm:$0xff] }
 0x3d5   : > { %1324 = vst [vmem:[#allocation3 + $0x20] sm:$0xff] %v1322_v25  ;;  %1506 = vmatpush1.bf16.msra.mxu0 %v1322_v25 }
 0x3d6   : > { %1507 = vmatprep.subr.bf16.mxu0 %v3252_v22 }
 0x3d7   : > { %v1344_v26 = vpop.permute.xlu1 %1343  ;;  %v1436_v35 = vpop.permute.xlu0 %1435 }
 0x3d8   : > { %v1346_v6 = vsel %vm1345_vm10, %v1342_v17, %v1344_v26  ;;  %v1703_v17 = vshra.s32 %v3039_v50, 2 }
 0x3d9   : > { %1348 = vst [vmem:[#allocation3 + $0x40] sm:$0xff] %v1346_v6  ;;  %1508 = vmatpush1.bf16.msra.mxu0 %v1346_v6 }
 0x3da   : > { %1509 = vmatprep.subr.bf16.mxu0 %v3252_v22  ;;  %v1704_v20 = vand.u32 3, %v1703_v17 }
 0x3db   : > { %v1367_v28 = vpop.permute.xlu1 %1366  ;;  %v1460_v38 = vpop.permute.xlu0 %1459 }
 0x3dc   : > { %v1369_v29 = vsel %vm1368_vm9, %v1365_v23, %v1367_v28  ;;  %vm1707_vm14 = vcmp.eq.s32.totalorder %v1704_v20, 0  ;;  %vm1708_vm8 = vcmp.eq.s32.totalorder %v1704_v20, 3  ;;  %v2212_v23 = vld [vmem:[%s3494_s7 + $0x40] sm:$0xff] }
 0x3dd   : > { %1371 = vst [vmem:[#allocation3 + $0x60] sm:$0xff] %v1369_v29  ;;  %1510 = vmatpush1.bf16.msra.mxu0 %v1369_v29  ;;  %vm1709_vm0 = vmor %vm1707_vm14, %vm3317_vm2 }
 0x3de   : > { %1511 = vmatprep.subr.bf16.mxu0 %v3252_v22  ;;  %vm1710_vm7 = vmpackc.low %vm1709_vm0, %vm1709_vm0 }
 0x3df   : > { %v1392_v31 = vpop.permute.xlu1 %1391  ;;  %v1711_v50 = vsel %vm1710_vm7, 65537, %v3252_v22  ;;  %vm1733_vm6 = vmpackc.low %vm1707_vm14, %vm1707_vm14 }
 0x3e0   : > { %v1393_v32 = vsel %vm866_vm5, %v1390_v27, %v1392_v31  ;;  %v1715_v24 = vrot.slane %v1711_v50, %v3089_v18  ;;  %v1734_v25 = vsel %vm1733_vm6, 65537, %v3252_v22  ;;  %vm1756_vm10 = vmor %vm1707_vm14, %vm3324_vm13 }
 0x3e1   : > { %1395 = vst [vmem:[#allocation3 + $0xa0] sm:$0xff] %v1393_v32  ;;  %1512 = vmatpush1.bf16.msra.mxu0 %v3199_v54  ;;  %v1738_v6 = vrot.slane %v1734_v25, %v3089_v18  ;;  %vm1836_vm0 = vmpackc.low %vm1708_vm8, %vm1708_vm8 }
 0x3e2   : > { %1513 = vmatprep.subr.bf16.mxu0 %v3252_v22 }
 0x3e3   : > { %v1415_v33 = vpop.permute.xlu1 %1414 }
 0x3e4   : > { %v1417_v34 = vsel %vm1416_vm1, %v1413_v30, %v1415_v33  ;;  %vm1757_vm1 = vmpackc.low %vm1756_vm10, %vm1756_vm10  ;;  %v1804_v30 = vsel %vm1803_vm15, 65537, %v3252_v22 }
 0x3e5   : > { %1419 = vst [vmem:[#allocation3 + $0xc0] sm:$0xff] %v1417_v34  ;;  %1514 = vmatpush1.bf16.msra.mxu0 %v1393_v32  ;;  %v1758_v27 = vsel %vm1757_vm1, 65537, %v3252_v22  ;;  %v1808_v32 = vrot.slane %v1804_v30, %v3089_v18 }
 0x3e6   : > { %1515 = vmatprep.subr.bf16.mxu0 %v3252_v22  ;;  %v1762_v29 = vrot.slane %v1758_v27, %v3089_v18 }
 0x3e7   : > { %v1438_v36 = vpop.permute.xlu1 %1437 }
 0x3e8   : > { %v1440_v37 = vsel %vm1439_vm11, %v1436_v35, %v1438_v36 }
 0x3e9   : > { %1442 = vst [vmem:[#allocation3 + $0xe0] sm:$0xff] %v1440_v37  ;;  %1516 = vmatpush1.bf16.msra.mxu0 %v1417_v34  ;;  %v1837_v34 = vsel %vm1836_vm0, 65537, %v3252_v22 }
 0x3ea   : > { %1517 = vmatprep.subr.bf16.mxu0 %v3252_v22  ;;  %v1841_v36 = vrot.slane %v1837_v34, %v3089_v18 }
 0x3eb   : > { %v1462_v39 = vpop.permute.xlu1 %1461 }
 0x3ec   : > { %v1464_v40 = vsel %vm1463_vm12, %v1460_v38, %v1462_v39  ;;  %v1484_v46 = vpop.permute.xlu0 %1483  ;;  %vm1819_vm12 = vmor %vm1708_vm8, %vm3317_vm2 }
 0x3ed   : > { %1466 = vst [vmem:[#allocation3 + $0x100] sm:$0xff] %v1464_v40  ;;  %1518 = vmatpush1.bf16.msra.mxu0 %v1440_v37 }
 0x3ee   : > { %1519 = vmatprep.subr.bf16.mxu0 %v3252_v22 }
 0x3f1   : > { %1520 = vmatpush1.bf16.msra.mxu0 %v1464_v40 }
 0x3f4   : > { %1536 = vmatmul.mubr.bf16.vlgmr.msra.gmra.mrb[20].mxu0 %v2460_v41 }
 0x3fc   : > { %v1489_v42 = vpop.permute.xlu1 %1488 }
 0x400   : > { %v1567_v43 = vpop.permute.xlu1 %1566 }
 0x401   : > { %v1573_v44 = vmax.bf16 %v1567_v43, %v3011_v7 }
 0x403   : > { %1578 = vrot.lane.b32.xlu1 %v1573_v44, %s2722_s17 }
 0x407   : > { %771 = vperm.xlu1 %2422, %v2153_v45  }
 0x40b   : > { %1739 = vrot.lane.b32.xlu1 %v1738_v6, %s2729_s15 }
 0x475   : > { %v1579_v38 = vpop.permute.xlu1 %1578 }
 0x486   : > { %v772_v45 = vpop.permute.xlu1 %771 }
 0x4c7   : > { %v1537_v47 = vpop.f32.mrb[20].mxu0 }
 0x4c8   : > { %v1538_v48 = vadd.f32 %v1537_v47, %v1484_v46  ;;  %v1539_v49 = vpop.f32.mrb[21].mxu0  ;;  %v1740_v46 = vpop.permute.xlu1 %1739 }
 0x4c9   : > { %v1540_v0 = vpop.f32.mrb[22].mxu0  ;;  %vm1741_vm15 = vcmp.ne.s16.totalorder %v1740_v46, 0 }
 0x4ca   : > { %v2198_v51 = vmul.f32 -1.442695, %v1538_v48  ;;  %v1541_v52 = vadd.f32 %v1540_v0, %v1489_v42  ;;  %v1542_v53 = vpop.f32.mrb[23].mxu0  ;;  %v1742_v47 = vsel %vm1741_vm15, 0, %v3169_v3 }
 0x4cc   : > { %2512 = vpow2.f32 %v2198_v51  ;;  %v2199_v54 = vmul.f32 -1.442695, %v1541_v52  ;;  %v821_v51 = vadd.f32 %v3163_v60, %v772_v45 }
 0x4ce   : > { %2514 = vpow2.f32 %v2199_v54  ;;  %v2157_v53 = vmul.f32 -1.442695, %v821_v51 }
 0x4d6   : > { %v2513_v7 = vpop.eup %2512 }
 0x4d7   : > { %v1550_v56 = vadd.f32 1.0, %v2513_v7 }
 0x4d8   : > { %v2515_v57 = vpop.eup %2514 }
 0x4d9   : > { %2516 = vrcp.f32 %v1550_v56  ;;  %v1551_v58 = vadd.f32 1.0, %v2515_v57 }
 0x4db   : > { %2518 = vrcp.f32 %v1551_v58 }
 0x4e3   : > { %v2517_v59 = vpop.eup %2516 }
 0x4e4   : > { %v1556_v61 = vmul.f32 %v2517_v59, %v1538_v48 }
 0x4e5   : > { %v2519_v63 = vpop.eup %2518 }
 0x4e6   : > { %1968 = vst [vmem:[%s3004_s29 + $0x20] sm:$0xff] %v1556_v61  ;;  %v1557_v1 = vmul.f32 %v2519_v63, %v1541_v52 }
 0x4e8   : > { %v1558_v4 = vpack.c.bf16 %v1557_v1, %v1556_v61  ;;  %1969 = vst [vmem:[%s3004_s29 + $0x50] sm:$0xff] %v1557_v1  ;;  %v1689_v1 = vstv %s2208_s24 }
 0x4ea   : > { %1559 = vst [vmem:[#allocation2 + $0x8] sm:$0xff] %v1558_v4  ;;  %1564 = vrot.lane.b32.xlu0 %v1558_v4, %s2719_s13 }
 0x55c   : > { %v1565_v13 = vpop.permute.xlu0 %1564 }
 0x55d   : > { %v1568_v15 = vsel %vm866_vm5, %v1565_v13, %v1567_v43  ;;  %vm1780_vm5 = vmpackc.low %vm3317_vm2, %vm3317_vm2 }
 0x55e   : > { %v1570_v16 = vmax.bf16 %v1568_v15, %v1558_v4  ;;  %v1781_v26 = vsel %vm1780_vm5, 65537, %v3252_v22  ;;  %vm1820_vm5 = vmpackc.low %vm1819_vm12, %vm1819_vm12  ;;  %vm1727_vm12 = vcmask 39936  }
 0x55f   : > { %v1785_v28 = vrot.slane %v1781_v26, %v3089_v18  ;;  %v1821_v31 = vsel %vm1820_vm5, 65537, %v3252_v22  ;;  %vm1852_vm2 = vmor %vm1708_vm8, %vm3324_vm13  ;;  %vm1750_vm5 = vcmask 31744  }
 0x560   : > { %1576 = vrot.lane.b32.xlu0 %v1570_v16, %s2722_s17  ;;  %s2728_s17 = smov 123   ;;  %vm1853_vm14 = vmpackc.low %vm1852_vm2, %vm1852_vm2  ;;  %v1825_v33 = vrot.slane %v1821_v31, %v3089_v18 }
 0x561   : > { %1786 = vrot.lane.b32.xlu1 %v1785_v28, %s2719_s13  ;;  %v1854_v35 = vsel %vm1853_vm14, 65537, %v3252_v22  ;;  %v2213_v28 = vld [vmem:[%s3494_s7 + $0x48] sm:$0xff] }
 0x562   : > { %v1858_v37 = vrot.slane %v1854_v35, %v3089_v18 }
 0x564   : > { %766 = vperm.xlu0 %2421, %v2152_v19  }
 0x565   : > { %1826 = vrot.lane.b32.xlu1 %v1825_v33, %s2731_s16 }
 0x568   : > { %1716 = vrot.lane.b32.xlu0 %v1715_v24, %s2728_s17 }
 0x569   : > { %1859 = vrot.lane.b32.xlu1 %v1858_v37, %s2733_s30 }
 0x56c   : > { %1763 = vrot.lane.b32.xlu0 %v1762_v29, %s2730_s12  ;;  %v2469_v29 = vld [vmem:[%s3495_s8 + $0x14] ss:$8 sps:$4 sm:$0xff]  }
 0x570   : > { %1809 = vrot.lane.b32.xlu0 %v1808_v32, %s2724_s11 }
 0x574   : > { %1842 = vrot.lane.b32.xlu0 %v1841_v36, %s2732_s20 }
 0x5d2   : > { %v1577_v39 = vpop.permute.xlu0 %1576 }
 0x5d3   : > { %v1580_v40 = vsel %vm1439_vm11, %v1577_v39, %v1579_v38  ;;  %v1787_v49 = vpop.permute.xlu1 %1786 }
 0x5d4   : > { %v1582_v41 = vmax.bf16 %v1580_v40, %v1570_v16  ;;  %vm1788_vm7 = vcmp.ne.s16.totalorder %v1787_v49, 0 }
 0x5d5   : > { %v1789_v0 = vsel %vm1788_vm7, 0, %v3169_v3 }
 0x5d6   : > { %2314 = vmatmul.mubr.bf16.vlgmr.msra.gmra.mrb[4].mxu1 %v1582_v41 }
 0x5d7   : > { %v1827_v24 = vpop.permute.xlu1 %1826  ;;  %2216 = vmatprep.mubr.msk.bf16.mxu1 %vm694_vm3, %v2469_v29  ;;  %vm1774_vm3 = vcmask 23552  }
 0x5d8   : > { %vm1828_vm10 = vcmp.ne.s16.totalorder %v1827_v24, 0 }
 0x5db   : > { %v1860_v26 = vpop.permute.xlu1 %1859 }
 0x5dc   : > { %vm1861_vm1 = vcmp.ne.s16.totalorder %v1860_v26, 0 }
 0x5e3   : > { %v767_v42 = vpop.permute.xlu0 %766 }
 0x5e4   : > { %v818_v43 = vadd.f32 %v3160_v55, %v767_v42 }
 0x5e6   : > { %v2156_v52 = vmul.f32 -1.442695, %v818_v43 }
 0x5e7   : > { %v1717_v44 = vpop.permute.xlu0 %1716 }
 0x5e8   : > { %vm1718_vm13 = vcmp.ne.s16.totalorder %v1717_v44, 0  ;;  %2520 = vpow2.f32 %v2156_v52 }
 0x5e9   : > { %v1719_v18 = vsel %vm1718_vm13, 0, %v3169_v3  ;;  %2522 = vpow2.f32 %v2157_v53  ;;  %v2471_v53 = vld [vmem:[%s3495_s8 + $0x10] ss:$8 sps:$4 sm:$0xff]  }
 0x5ea   : > { %1723 = vrot.lane.b32.xlu0 %v1719_v18, %s2733_s30 }
 0x5eb   : > { %v1764_v48 = vpop.permute.xlu0 %1763 }
 0x5ec   : > { %vm1765_vm11 = vcmp.ne.s16.totalorder %v1764_v48, 0 }
 0x5ed   : > { %v1766_v55 = vsel %vm1765_vm11, 0, %v3169_v3  ;;  %v1693_v3 = vstv %s2209_s26 }
 0x5ee   : > { %1746 = vrot.lane.b32.xlu0 %v1742_v47, %s2732_s20 }
 0x5ef   : > { %v1810_v15 = vpop.permute.xlu0 %1809 }
 0x5f0   : > { %vm1811_vm6 = vcmp.ne.s16.totalorder %v1810_v15, 0 }
 0x5f2   : > { %1770 = vrot.lane.b32.xlu0 %v1766_v55, %s2731_s16  ;;  %v2521_v54 = vpop.eup %2520 }
 0x5f3   : > { %v2523_v7 = vpop.eup %2522  ;;  %v830_v56 = vadd.f32 1.0, %v2521_v54  ;;  %v1843_v19 = vpop.permute.xlu0 %1842 }
 0x5f4   : > { %v831_v57 = vadd.f32 1.0, %v2523_v7  ;;  %vm1844_vm8 = vcmp.ne.s16.totalorder %v1843_v19, 0 }
 0x5f5   : > { %2524 = vrcp.f32 %v830_v56 }
 0x5f6   : > { %1793 = vrot.lane.b32.xlu0 %v1789_v0, %s2724_s11  ;;  %2526 = vrcp.f32 %v831_v57 }
 0x5ff   : > { %v2525_v58 = vpop.eup %2524 }
 0x600   : > { %v2527_v59 = vpop.eup %2526  ;;  %v836_v61 = vmul.f32 %v2525_v58, %v818_v43 }
 0x601   : > { %v837_v62 = vmul.f32 %v2527_v59, %v821_v51 }
 0x602   : > { %v1690_v60 = vmul.f32 %v1689_v1, %v836_v61 }
 0x603   : > { %v1691_v10 = vmul.f32 %v1689_v1, %v837_v62 }
 0x65c   : > { %v1724_v30 = vpop.permute.xlu0 %1723 }
 0x660   : > { %v1747_v31 = vpop.permute.xlu0 %1746 }
 0x664   : > { %v1771_v32 = vpop.permute.xlu0 %1770 }
 0x668   : > { %v1794_v33 = vpop.permute.xlu0 %1793 }
 0x6a9   : > { %v1681_v63 = vpop.f32.mrb[4].mxu1 }
 0x6aa   : > { %v1694_v2 = vmul.f32 %v1693_v3, %v1681_v63  ;;  %v2315_v4 = vpop.f32.mrb[5].mxu1 }
 0x6ab   : > { %v1684_v5 = vpop.f32.mrb[6].mxu1 }
 0x6ac   : > { %v1696_v8 = vadd.f32 %v1694_v2, %v1690_v60  ;;  %v1695_v11 = vmul.f32 %v1693_v3, %v1684_v5  ;;  %v2316_v9 = vpop.f32.mrb[7].mxu1 }
 0x6ae   : > { %v1697_v12 = vadd.f32 %v1695_v11, %v1691_v10 }
 0x6b0   : > { %v1698_v13 = vpack.c.bf16 %v1697_v12, %v1696_v8 }
 0x6b2   : > { %1699 = vst.msk [vmem:[#allocation2 + $0x8] sm:$0xff] %vm779_vm4, %v1698_v13 }
 0x6b9   : > { %v1732_v16 = vld [vmem:[#allocation2 + $0x8] sm:$0xff] }
 0x6ba   : > { %1801 = vst.msk [vmem:[#allocation3 + $0x80] sm:$0xff] %vm779_vm4, %v1732_v16  ;;  %v1812_v14 = vsel %vm1811_vm6, 0, %v1732_v16  ;;  %v1720_v17 = vsel %vm1718_vm13, 0, %v1732_v16  ;;  %v1743_v20 = vsel %vm1741_vm15, 0, %v1732_v16  ;;  %v1845_v21 = vsel %vm1844_vm8, 0, %v1732_v16 }
 0x6bb   : > { %1814 = vrot.lane.b32.xlu0 %v1812_v14, %s2719_s13  ;;  %1725 = vrot.lane.b32.xlu1 %v1720_v17, %s2733_s30  ;;  %v1767_v50 = vsel %vm1765_vm11, 0, %v1732_v16  ;;  %v1790_v25 = vsel %vm1788_vm7, 0, %v1732_v16  ;;  %v1829_v6 = vsel %vm1828_vm10, 0, %v1732_v16  ;;  %v1862_v27 = vsel %vm1861_vm1, 0, %v1732_v16  ;;  %s3544_s30 = sld [smem:[#allocation23_spill]]  ;;  %s2640_s13 = scalar_lea.vmem %s2639_s19, 3072 }
 0x6bf   : > { %1847 = vrot.lane.b32.xlu0 %v1845_v21, %s2729_s15  ;;  %1748 = vrot.lane.b32.xlu1 %v1743_v20, %s2732_s20  ;;  %s2318_s15 = smul.u32 1536, %s2818_s21  ;;  %s3446_s21 = scalar_lea.sflag [#allocation6], %s463_s23 }
 0x6c1   : > { %v1875_v55 = vld [vmem:[#allocation3 + $0x80] sm:$0xff]  ;;  %s3436_s26 = scalar_lea.hbm %s3544_s30, %s2318_s15 }
 0x6c3   : > { %1885 = vperm.xlu0 %2421, %v2212_v23   ;;  %1772 = vrot.lane.b32.xlu1 %v1767_v50, %s2731_s16 }
 0x6c7   : > { %1795 = vrot.lane.b32.xlu1 %v1790_v25, %s2724_s11 }
 0x6cb   : > { %1831 = vrot.lane.b32.xlu1 %v1829_v6, %s2730_s12  ;;  %s1986_s12 = sshll.u32 %s3004_s29, 4  ;;  %s3438_s12 = int_to_ptr.vmem [resolvable:$true] %s1986_s12 }
 0x6cc   : > { %s2634_s24 = scalar_lea.vmem %s3438_s12, 1536  ;;  %p2641_p10 = scmp.lt.s32.totalorder %s3438_s12, %s2639_s19 }
 0x6cd   : > { %p2635_p11 = scmp.ne.s32.totalorder %s3438_s12, %s2634_s24  ;;  %p2642_p13 = scmp.lt.s32.totalorder %s2640_s13, %s2634_s24 }
 0x6cf   : > { %1864 = vrot.lane.b32.xlu1 %v1862_v27, %s2728_s17  ;;  %p2636_p6 = pnand %p2635_p11, %p3545_p5  ;;  %p2643_p1 = por %p2642_p13, %p2641_p10 }
 0x6d1   : > { %p2637_p9 = pneg %p2636_p6 }
 0x6d3   : > { %1890 = vperm.xlu1 %2422, %v2213_v28   ;;  %p2644_p0 = pnand %p2643_p1, %p2637_p9 }
 0x72d   : > { %v1815_v34 = vpop.permute.xlu0 %1814  ;;  %v1726_v35 = vpop.permute.xlu1 %1725 }
 0x72e   : > { %1817 = vst.msk [vmem:[#allocation3 + $0xa0] sm:$0xff] %vm779_vm4, %v1815_v34  ;;  %v1728_v36 = vsel %vm1727_vm12, %v1724_v30, %v1726_v35 }
 0x72f   : > { %1730 = vst.msk [vmem:[#allocation3] sm:$0xff] %vm779_vm4, %v1728_v36 }
 0x731   : > { %v1848_v37 = vpop.permute.xlu0 %1847  ;;  %v1749_v38 = vpop.permute.xlu1 %1748 }
 0x732   : > { %1850 = vst.msk [vmem:[#allocation3 + $0xe0] sm:$0xff] %vm779_vm4, %v1848_v37  ;;  %v1751_v39 = vsel %vm1750_vm5, %v1747_v31, %v1749_v38 }
 0x733   : > { %1753 = vst.msk [vmem:[#allocation3 + $0x20] sm:$0xff] %vm779_vm4, %v1751_v39 }
 0x735   : > { %v1773_v40 = vpop.permute.xlu1 %1772  ;;  %v1876_v49 = vld [vmem:[#allocation3 + $0xa0] sm:$0xff] }
 0x736   : > { %v1775_v41 = vsel %vm1774_vm3, %v1771_v32, %v1773_v40  ;;  %v1871_v42 = vld [vmem:[#allocation3] sm:$0xff] }
 0x737   : > { %1777 = vst.msk [vmem:[#allocation3 + $0x40] sm:$0xff] %vm779_vm4, %v1775_v41  ;;  %1906 = vmatpush1.bf16.msra.mxu1 %v1871_v42 }
 0x738   : > { %1907 = vmatprep.subr.bf16.mxu1 %v3252_v22 }
 0x739   : > { %v1796_v43 = vpop.permute.xlu1 %1795  ;;  %v1878_v51 = vld [vmem:[#allocation3 + $0xe0] sm:$0xff] }
 0x73a   : > { %v1797_v44 = vsel %vm1368_vm9, %v1794_v33, %v1796_v43  ;;  %v1872_v18 = vld [vmem:[#allocation3 + $0x20] sm:$0xff] }
 0x73b   : > { %1799 = vst.msk [vmem:[#allocation3 + $0x60] sm:$0xff] %vm779_vm4, %v1797_v44  ;;  %1908 = vmatpush1.bf16.msra.mxu1 %v1872_v18 }
 0x73c   : > { %1909 = vmatprep.subr.bf16.mxu1 %v3252_v22 }
 0x73d   : > { %v1832_v45 = vpop.permute.xlu1 %1831 }
 0x73e   : > { %1834 = vst.msk [vmem:[#allocation3 + $0xc0] sm:$0xff] %vm779_vm4, %v1832_v45  ;;  %v1873_v46 = vld [vmem:[#allocation3 + $0x40] sm:$0xff] }
 0x73f   : > { %1910 = vmatpush1.bf16.msra.mxu1 %v1873_v46 }
 0x740   : > { %1911 = vmatprep.subr.bf16.mxu1 %v3252_v22 }
 0x741   : > { %v1865_v47 = vpop.permute.xlu1 %1864 }
 0x742   : > { %1867 = vst.msk [vmem:[#allocation3 + $0x100] sm:$0xff] %vm779_vm4, %v1865_v47  ;;  %v1874_v48 = vld [vmem:[#allocation3 + $0x60] sm:$0xff]  ;;  %v1886_v54 = vpop.permute.xlu0 %1885 }
 0x743   : > { %1912 = vmatpush1.bf16.msra.mxu1 %v1874_v48 }
 0x744   : > { %1913 = vmatprep.subr.bf16.mxu1 %v3252_v22 }
 0x745   : > { %v1877_v0 = vld [vmem:[#allocation3 + $0xc0] sm:$0xff] }
 0x747   : > { %1914 = vmatpush1.bf16.msra.mxu1 %v1875_v55 }
 0x748   : > { %1915 = vmatprep.subr.bf16.mxu1 %v3252_v22 }
 0x749   : > { %v1879_v52 = vld [vmem:[#allocation3 + $0x100] sm:$0xff] }
 0x74b   : > { %1916 = vmatpush1.bf16.msra.mxu1 %v1876_v49 }
 0x74c   : > { %1917 = vmatprep.subr.bf16.mxu1 %v3252_v22 }
 0x74f   : > { %1918 = vmatpush1.bf16.msra.mxu1 %v1877_v0 }
 0x750   : > { %1919 = vmatprep.subr.bf16.mxu1 %v3252_v22 }
 0x752   : > { %v1891_v58 = vpop.permute.xlu1 %1890 }
 0x753   : > { %1920 = vmatpush1.bf16.msra.mxu1 %v1878_v51 }
 0x754   : > { %1921 = vmatprep.subr.bf16.mxu1 %v3252_v22 }
 0x757   : > { %1922 = vmatpush1.bf16.msra.mxu1 %v1879_v52 }
 0x75a   : > { %1938 = vmatmul.mubr.bf16.vlgmr.msra.gmra.mrb[8].mxu1 %v2471_v53 }
 0x82d   : > { %v1939_v7 = vpop.f32.mrb[8].mxu1 }
 0x82e   : > { %v1940_v56 = vadd.f32 %v1939_v7, %v1886_v54  ;;  %v1941_v57 = vpop.f32.mrb[9].mxu1 }
 0x82f   : > { %v1942_v59 = vpop.f32.mrb[10].mxu1 }
 0x830   : > { %v2217_v61 = vmul.f32 -1.442695, %v1940_v56  ;;  %v1943_v3 = vadd.f32 %v1942_v59, %v1891_v58  ;;  %v1944_v62 = vpop.f32.mrb[11].mxu1 }
 0x832   : > { %2528 = vpow2.f32 %v2217_v61  ;;  %v2218_v22 = vmul.f32 -1.442695, %v1943_v3 }
 0x834   : > { %2530 = vpow2.f32 %v2218_v22 }
 0x83c   : > { %v2529_v63 = vpop.eup %2528 }
 0x83d   : > { %v1952_v1 = vadd.f32 1.0, %v2529_v63 }
 0x83e   : > { %v2531_v60 = vpop.eup %2530 }
 0x83f   : > { %2532 = vrcp.f32 %v1952_v1  ;;  %v1953_v2 = vadd.f32 1.0, %v2531_v60 }
 0x841   : > { %2534 = vrcp.f32 %v1953_v2 }
 0x849   : > { %v2533_v4 = vpop.eup %2532 }
 0x84a   : > { %v1958_v5 = vmul.f32 %v2533_v4, %v1940_v56 }
 0x84b   : > { %v2535_v8 = vpop.eup %2534 }
 0x84c   : > { %1970 = vst.msk [vmem:[%s3004_s29 + $0x28] sm:$0xff] %vm779_vm4, %v1958_v5  ;;  %v1959_v10 = vmul.f32 %v2535_v8, %v1943_v3 }
 0x84e   : > { %1971 = vst.msk [vmem:[%s3004_s29 + $0x58] sm:$0xff] %vm779_vm4, %v1959_v10 }
 0x84f   : > { %2647 = shalt.err (!%p2644_p0)
}
 0x850   : > { %s2648_s23 = scalar_lea.hbm %s3436_s26, 1536  ;;  %s2652_s25 = scalar_lea.hbm %s3544_s30, 3072 }
 0x851   : > { %p2649_p2 = scmp.ne.s32.totalorder %s3436_s26, %s2648_s23  ;;  %p2653_p7 = scmp.lt.u32.totalorder %s3436_s26, %s3544_s30 }
 0x852   : > { %p2654_p12 = scmp.lt.u32.totalorder %s2652_s25, %s2648_s23  ;;  %p2656_p11 = scmp.lt.u32.totalorder %s2648_s23, %s3436_s26 }
 0x853   : > { %p2650_p3 = pnand %p2649_p2, %p3545_p5 }
 0x854   : > { %p2655_p8 = por %p2654_p12, %p2653_p7 }
 0x855   : > { %p2651_p4 = pneg %p2650_p3 }
 0x856   : > { %p2657_p6 = por %p2656_p11, %p2655_p8 }
 0x858   : > { %p2658_p9 = pnand %p2657_p6, %p2651_p4 }
 0x85a   : > { %2661 = shalt.err (!%p2658_p9)
}
 0x85b   : > { %s2735_s17 = smov 768   ;;  %s2736_s15 = smov 48  }
 0x85c   : > { %2335 = dma.vmem_to_hbm [thread:$0]  (%p3545_p5), %s3438_s12, 1536, %s3436_s26, %s3446_s21, %s2735_s17, %s2735_s17, %s2736_s15  }
 0x85d PF: > { %s3546_s16 = sld [smem:[#allocation19_spill]]  ;;  %s3547_s20 = sld [smem:[#allocation17_spill]] }
 0x85e   : > { %s3548_s24 = sld [smem:[#allocation22_spill]] }
 0x863   : > { %p2362_p10 = scmp.ge.s32.totalorder %s3546_s16, 2  ;;  %s2001_s22 = sand.u32 1, %s3547_s20  }
 0x864   : > { %p3549_p13 = scmp.ne.s32.totalorder %s3548_s24, 0  ;;  %s2002_s19 = scalar_lea.sflag [#allocation6], %s2001_s22 }
 0x866   : > { %p2351_p1 = pnand %p2362_p10, %p3549_p13 }
 0x868   : > { %2691 = dma.done.wait (!%p2351_p1), %s2002_s19, 1536  }
 0x869   : > { %2693 = vsyncadd (!%p2351_p1), %s2002_s19, 4294965760  ;;  %s3550_s20 = sld [smem:[#allocation20_spill]]  ;;  %s3551_s13 = sld [smem:[#allocation18_spill]] }
 0x86a   : > { %s3552_s19 = sld [smem:[#allocation21_spill]]  ;;  %s3553_s17 = smov %s2700_s18 }
 0x86f   : > { %p24_p0 = scmp.ge.s32.totalorder %s3550_s20, 4   ;;  %s3554_s18 = smov %s3551_s13 }
 0x871   :  { %26 = sbr.rel (!%p24_p0) target bundleno = 8 (0x8), region = 128 }
 0x878   :  { %2007 = vsyncpa [#allocation5], 1 }
 0x879   :  { %2009 = vsyncpa [#allocation5 + $0x1], 1 }
 0x87a   :  { %2010 = vsyncpa [#allocation10], 1 }
 0x87b   :  { %2011 = vsyncpa [#allocation6], 1 }
 0x87c   :  { %2013 = vsyncpa [#allocation6 + $0x1], 1 }
 0x87d   :  { %2014 = vsyncpa [#allocation7], 1 }
 0x87e   :  { %2016 = vsyncpa [#allocation7 + $0x1], 1 }

</bundles_post_ra>
